<compile_context>
chip_gen: v6e
topology: v6e:2x2x1
jax: 0.10.0
libtpu: 0.0.40
codegen_flags: <defaults>
</compile_context>

<pallas_src>
import functools

import jax
import jax.numpy as jnp
from jax import lax
from jax.experimental import pallas as pl
from jax.experimental.pallas import tpu as pltpu

EPS = 1e-5  # torch.nn.LayerNorm default


def _gelu_exact(x):
    # torch.nn.GELU() default (erf form).
    return 0.5 * x * (1.0 + lax.erf(x * 0.7071067811865476))


_SQRT_2_OVER_PI = 0.7978845608028654


def _gelu_tanh(x):
    # tanh approximation -> EUP slot instead of a long VPU erf polynomial.
    return 0.5 * x * (1.0 + jnp.tanh(_SQRT_2_OVER_PI * (x + 0.044715 * x * x * x)))


def _layernorm(x, gamma, beta):
    mu = jnp.mean(x, axis=-1, keepdims=True)
    var = jnp.mean((x - mu) ** 2, axis=-1, keepdims=True)
    return (x - mu) * lax.rsqrt(var + EPS) * gamma + beta


# --------------------------------- kernel -----------------------------------
def _dec_layer_kernel(approx_gelu,
                      hv_ref, he_ref, ma_ref, mv_ref,
                      w1v_ref, w1e_ref, b1_ref,
                      w2_ref, b2_ref, w3_ref, b3_ref,
                      g1_ref, be1_ref,
                      win_ref, bin_ref, wout_ref, bout_ref,
                      g2_ref, be2_ref,
                      out_ref, acc_ref, tv_ref):
    j = pl.program_id(1)
    last_j = pl.num_programs(1) - 1
    gelu = _gelu_tanh if approx_gelu else _gelu_exact

    he = he_ref[...]                               # [TN, TK, Cin]
    TN, TK, Cin = he.shape
    H = hv_ref.shape[1]
    cdt = he.dtype                                 # matmul operand dtype

    @pl.when(j == 0)
    def _init():
        acc_ref[...] = jnp.zeros_like(acc_ref)
        # per-token half of W1 on the [h_V, h_E] concat, bias folded in once
        tv_ref[...] = (jnp.dot(hv_ref[...].astype(cdt), w1v_ref[...],
                               preferred_element_type=jnp.float32)
                       + b1_ref[...])

    # message MLP on this K-chunk:  W3(gelu(W2(gelu(W1([h_V, h_E])))))
    m = jnp.dot(he.reshape(TN * TK, Cin), w1e_ref[...],
                preferred_element_type=jnp.float32)            # [TN*TK, H]
    m = gelu(m.reshape(TN, TK, H) + tv_ref[...][:, None, :])
    m = m.reshape(TN * TK, H)
    m = gelu(jnp.dot(m.astype(cdt), w2_ref[...],
                     preferred_element_type=jnp.float32) + b2_ref[...])
    m = jnp.dot(m.astype(cdt), w3_ref[...],
                preferred_element_type=jnp.float32) + b3_ref[...]

    # neighbor mask (1/scale already folded in), partial sum over this chunk
    m = m.reshape(TN, TK, H) * ma_ref[...]                     # ma: [TN, TK, 1]
    acc_ref[...] += jnp.sum(m, axis=1)

    @pl.when(j == last_j)
    def _finalize():
        hv = hv_ref[...]
        # residual + LayerNorm1 (dropout = identity in eval mode)
        x = _layernorm(hv + acc_ref[...], g1_ref[...], be1_ref[...])
        # position-wise FFN
        h = gelu(jnp.dot(x.astype(cdt), win_ref[...],
                         preferred_element_type=jnp.float32) + bin_ref[...])
        h = jnp.dot(h.astype(cdt), wout_ref[...],
                    preferred_element_type=jnp.float32) + bout_ref[...]
        # residual + LayerNorm2, then mask_V
        y = _layernorm(x + h, g2_ref[...], be2_ref[...])
        out_ref[...] = (y * mv_ref[...]).astype(out_ref.dtype)


# ------------------------------ host helpers --------------------------------
def prepare_weights(params, *, use_bf16=True):
    """One-time weight split / transpose / cast (hoist out of the hot path)."""
    cdt = jnp.bfloat16 if use_bf16 else jnp.float32
    H = params["W2_w"].shape[0]
    row = lambda v: jnp.asarray(v, jnp.float32).reshape(1, -1)
    W1 = jnp.asarray(params["W1_w"])
    return (
        W1[:, :H].T.astype(cdt),                       # w1v  [H, H]
        W1[:, H:].T.astype(cdt),                       # w1e  [Cin, H]
        row(params["W1_b"]),
        jnp.asarray(params["W2_w"]).T.astype(cdt), row(params["W2_b"]),
        jnp.asarray(params["W3_w"]).T.astype(cdt), row(params["W3_b"]),
        row(params["norm1_w"]), row(params["norm1_b"]),
        jnp.asarray(params["Win_w"]).T.astype(cdt), row(params["Win_b"]),
        jnp.asarray(params["Wout_w"]).T.astype(cdt), row(params["Wout_b"]),
        row(params["norm2_w"]), row(params["norm2_b"]),
    )


def _ceil_to(x, m):
    return ((x + m - 1) // m) * m


def _vmem_budget():
    # Per-generation budget: ~48 MiB tile budget on v7x (64 MiB VMEM),
    # ~87 MiB on v5e/v6e (128 MiB VMEM).  Conservative fallback = 64 MiB part.
    try:
        cap = int(pltpu.get_tpu_info().vmem_capacity_bytes)
    except Exception:
        cap = 64 << 20
    cap = max(cap, 32 << 20)
    return int(cap * 0.68), int(cap * 0.82)       # (tile budget, vmem_limit)


def _per_token_bytes(tk, H, Cin, item):
    return (2 * tk * Cin * item        # h_E block, double-buffered
            + 2 * tk * 512             # mask_attend block [tn, tk, 1] (lane-padded)
            + 5 * tk * H * 4           # live f32 + bf16 message slabs
            + 2 * 512                  # mask_V block
            + 6 * H * 4                # h_V / out blocks + acc + t_v scratch
            + 2 * 4 * H * 4            # FFN hidden
            + 8 * H * 4)               # LN / residual temporaries


def _auto_tiles(N, K, H, Cin, item, weight_bytes, budget, tn_req, tk_req):
    n8 = _ceil_to(max(N, 1), 8)
    cands = [K] + [d for d in range(8, K, 8) if K % d == 0]
    if tk_req is not None:
        t = int(tk_req)
        if t == K or (0 < t < K and K % t == 0 and t % 8 == 0):
            cands = [t]
    avail = max(budget - 2 * weight_bytes - (2 << 20), 1 << 20)
    best = (-1, -1)
    for tk in cands:
        tn = (avail // _per_token_bytes(tk, H, Cin, item)) // 8 * 8
        tn = max(8, min(tn, 512, n8))
        if (tn, tk) > best:
            best = (tn, tk)
    tn, tk = best
    if tn_req is not None:
        tn = max(8, min(_ceil_to(int(tn_req), 8), n8))
    # >= 2 token tiles so the "parallel" axis can use both TCs on v7x megacore.
    if N > 8:
        tn = min(tn, _ceil_to(pl.cdiv(N, 2), 8))
    return tn, tk


# ------------------------------ public wrapper -------------------------------
def dec_layer_j(h_V, h_E, mask_V, mask_attend, params, *,
                scale=30.0, use_bf16=True, approx_gelu=None,
                tn=None, tk=None, interpret=False):
    B, L, M, H = h_V.shape
    K, Cin = h_E.shape[-2], h_E.shape[-1]
    N = B * L * M
    if approx_gelu is None:
        approx_gelu = use_bf16
    cdt = jnp.bfloat16 if use_bf16 else jnp.float32
    item = jnp.dtype(cdt).itemsize

    weights = (prepare_weights(params, use_bf16=use_bf16)
               if isinstance(params, dict) else tuple(params))
    weight_bytes = sum(int(w.size) * w.dtype.itemsize for w in weights)

    budget, vmem_limit = _vmem_budget()
    tn_, tk_ = _auto_tiles(N, K, H, Cin, item, weight_bytes, budget, tn, tk)
    grid = (pl.cdiv(N, tn_), pl.cdiv(K, tk_))

    # Flat token-major activations.  NO padding of h_E / masks: partial edge
    # blocks are fine because rows never mix across the token axis and the
    # output store is masked to the valid rows.
    hv = h_V.reshape(N, H).astype(jnp.float32)
    he = h_E.reshape(N, K, Cin).astype(cdt)
    ma = mask_attend.reshape(N, K, 1).astype(jnp.float32) * jnp.float32(1.0 / scale)
    mv = mask_V.reshape(N, 1).astype(jnp.float32)

    def wspec(w):
        return pl.BlockSpec(w.shape, lambda i, j: (0,) * w.ndim)

    in_specs = [
        pl.BlockSpec((tn_, H), lambda i, j: (i, 0)),
        pl.BlockSpec((tn_, tk_, Cin), lambda i, j: (i, j, 0)),
        pl.BlockSpec((tn_, tk_, 1), lambda i, j: (i, j, 0)),
        pl.BlockSpec((tn_, 1), lambda i, j: (i, 0)),
    ] + [wspec(w) for w in weights]

    flops = 2 * N * K * H * (Cin + 2 * H) + 18 * N * H * H
    transcendentals = N * (2 * K * H + 4 * H)
    bytes_accessed = (int(hv.size) * 4 + int(he.size) * item +
                      int(ma.size) * 4 + int(mv.size) * 4 +
                      N * H * 4 + weight_bytes)

    out = pl.pallas_call(
        functools.partial(_dec_layer_kernel, approx_gelu),
        out_shape=jax.ShapeDtypeStruct((N, H), h_V.dtype),
        grid_spec=pltpu.PrefetchScalarGridSpec(
            num_scalar_prefetch=0,
            grid=grid,
            in_specs=in_specs,
            out_specs=pl.BlockSpec((tn_, H), lambda i, j: (i, 0)),
            scratch_shapes=[pltpu.VMEM((tn_, H), jnp.float32),   # dh accumulator
                            pltpu.VMEM((tn_, H), jnp.float32)],  # t_v cache
        ),
        compiler_params=pltpu.CompilerParams(
            dimension_semantics=("parallel", "arbitrary"),
            vmem_limit_bytes=int(vmem_limit)),
        cost_estimate=pl.CostEstimate(flops=int(flops),
                                      transcendentals=int(transcendentals),
                                      bytes_accessed=int(bytes_accessed)),
        interpret=interpret,
    )(hv, he, ma, mv, *weights)

    return out.reshape(B, L, M, H)


# ---------------- pure-JAX reference (for correctness check) ----------------
def dec_layer_j_ref(h_V, h_E, mask_V, mask_attend, params, *, scale=30.0):
    H = h_V.shape[-1]
    h_V_expand = jnp.broadcast_to(h_V[..., None, :], h_E.shape[:-1] + (H,))
    h_EV = jnp.concatenate([h_V_expand, h_E], axis=-1)
    m = _gelu_exact(h_EV @ params["W1_w"].T + params["W1_b"])
    m = _gelu_exact(m @ params["W2_w"].T + params["W2_b"])
    m = m @ params["W3_w"].T + params["W3_b"]
    m = mask_attend[..., None] * m
    dh = jnp.sum(m, axis=-2) / scale
    x = _layernorm(h_V + dh, params["norm1_w"], params["norm1_b"])
    h = _gelu_exact(x @ params["Win_w"].T + params["Win_b"])
    h = h @ params["Wout_w"].T + params["Wout_b"]
    y = _layernorm(x + h, params["norm2_w"], params["norm2_b"])
    return mask_V[..., None] * y


def init_params(key, H, Cin):
    ks = jax.random.split(key, 6)
    s = 0.05
    return {
        "W1_w": s * jax.random.normal(ks[0], (H, H + Cin), jnp.float32),
        "W1_b": jnp.full((H,), 0.01, jnp.float32),
        "W2_w": s * jax.random.normal(ks[1], (H, H), jnp.float32),
        "W2_b": jnp.full((H,), -0.01, jnp.float32),
        "W3_w": s * jax.random.normal(ks[2], (H, H), jnp.float32),
        "W3_b": jnp.full((H,), 0.02, jnp.float32),
        "norm1_w": jnp.ones((H,), jnp.float32),
        "norm1_b": jnp.zeros((H,), jnp.float32),
        "norm2_w": jnp.ones((H,), jnp.float32),
        "norm2_b": jnp.zeros((H,), jnp.float32),
        "Win_w": s * jax.random.normal(ks[3], (4 * H, H), jnp.float32),
        "Win_b": jnp.full((4 * H,), 0.005, jnp.float32),
        "Wout_w": s * jax.random.normal(ks[4], (H, 4 * H), jnp.float32),
        "Wout_b": jnp.full((H,), -0.005, jnp.float32),
    }


if __name__ == "__main__":
    # Small shapes: num_hidden=32, num_in=64, K=16 neighbors.
    # N = B*L*M = 20 (not a multiple of 8) to exercise the ragged token tail.
    B, L, M, K = 2, 5, 2, 16
    H, Cin = 32, 64
    key = jax.random.PRNGKey(0)
    k1, k2, k3, k4, kp = jax.random.split(key, 5)

    h_V = jax.random.normal(k1, (B, L, M, H), jnp.float32)
    h_E = jax.random.normal(k2, (B, L, M, K, Cin), jnp.float32)
    mask_attend = (jax.random.uniform(k3, (B, L, M, K)) > 0.3).astype(jnp.float32)
    mask_V = (jax.random.uniform(k4, (B, L, M)) > 0.2).astype(jnp.float32)
    params = init_params(kp, H, Cin)

    ref = dec_layer_j_ref(h_V, h_E, mask_V, mask_attend, params, scale=30.0)

    # 1) exact f32 path, forced small tiles: 2 token tiles (one partial) x 2 K-chunks.
    out_f32 = dec_layer_j(h_V, h_E, mask_V, mask_attend, params, scale=30.0,
                          use_bf16=False, approx_gelu=False, tn=16, tk=8)
    out_f32 = jax.block_until_ready(out_f32)
    assert out_f32.shape == (B, L, M, H)
    err_f32 = float(jnp.max(jnp.abs(out_f32 - ref)))
    assert err_f32 < 1e-4, err_f32

    # 2) fast path: weights prepared once (hoisted), bf16 operands, auto tiles.
    prepped = prepare_weights(params, use_bf16=True)
    out_fast = dec_layer_j(h_V, h_E, mask_V, mask_attend, prepped, scale=30.0,
                           use_bf16=True)
    out_fast = jax.block_until_ready(out_fast)
    assert out_fast.shape == (B, L, M, H)
    err_fast = float(jnp.max(jnp.abs(out_fast - ref)))
    assert err_fast < 5e-2, err_fast

    print("KERNEL_OK")
</pallas_src>

<mosaic_0001>
module attributes {stable_mosaic.version = 11 : i64} {
  func.func @_dec_layer_kernel(%arg0: i32, %arg1: i32, %arg2: memref<16x32xf32, #tpu.memory_space<vmem>>, %arg3: memref<16x8x64xf32, #tpu.memory_space<vmem>>, %arg4: memref<16x8x1xf32, #tpu.memory_space<vmem>>, %arg5: memref<16x1xf32, #tpu.memory_space<vmem>>, %arg6: memref<32x32xf32, #tpu.memory_space<vmem>>, %arg7: memref<64x32xf32, #tpu.memory_space<vmem>>, %arg8: memref<1x32xf32, #tpu.memory_space<vmem>>, %arg9: memref<32x32xf32, #tpu.memory_space<vmem>>, %arg10: memref<1x32xf32, #tpu.memory_space<vmem>>, %arg11: memref<32x32xf32, #tpu.memory_space<vmem>>, %arg12: memref<1x32xf32, #tpu.memory_space<vmem>>, %arg13: memref<1x32xf32, #tpu.memory_space<vmem>>, %arg14: memref<1x32xf32, #tpu.memory_space<vmem>>, %arg15: memref<32x128xf32, #tpu.memory_space<vmem>>, %arg16: memref<1x128xf32, #tpu.memory_space<vmem>>, %arg17: memref<128x32xf32, #tpu.memory_space<vmem>>, %arg18: memref<1x32xf32, #tpu.memory_space<vmem>>, %arg19: memref<1x32xf32, #tpu.memory_space<vmem>>, %arg20: memref<1x32xf32, #tpu.memory_space<vmem>>, %arg21: memref<16x32xf32, #tpu.memory_space<vmem>>, %arg22: memref<16x32xf32, #tpu.memory_space<vmem>>, %arg23: memref<16x32xf32, #tpu.memory_space<vmem>>) attributes {dimension_semantics = [#tpu.dimension_semantics<parallel>, #tpu.dimension_semantics<arbitrary>], iteration_bounds = array<i64: 2, 2>, scalar_prefetch = 0 : i64, scratch_operands = 2 : i64, tpu.core_type = #tpu.core_type<tc>, window_params = [{transform_indices = @transform_0, window_bounds = array<i64: 16, 32>}, {transform_indices = @transform_1, window_bounds = array<i64: 16, 8, 64>}, {transform_indices = @transform_2, window_bounds = array<i64: 16, 8, 1>}, {transform_indices = @transform_3, window_bounds = array<i64: 16, 1>}, {pipeline_mode = #tpu.pipeline_mode<synchronous>, transform_indices = @transform_4, window_bounds = array<i64: 32, 32>}, {pipeline_mode = #tpu.pipeline_mode<synchronous>, transform_indices = @transform_5, window_bounds = array<i64: 64, 32>}, {pipeline_mode = #tpu.pipeline_mode<synchronous>, transform_indices = @transform_6, window_bounds = array<i64: 1, 32>}, {pipeline_mode = #tpu.pipeline_mode<synchronous>, transform_indices = @transform_7, window_bounds = array<i64: 32, 32>}, {pipeline_mode = #tpu.pipeline_mode<synchronous>, transform_indices = @transform_8, window_bounds = array<i64: 1, 32>}, {pipeline_mode = #tpu.pipeline_mode<synchronous>, transform_indices = @transform_9, window_bounds = array<i64: 32, 32>}, {pipeline_mode = #tpu.pipeline_mode<synchronous>, transform_indices = @transform_10, window_bounds = array<i64: 1, 32>}, {pipeline_mode = #tpu.pipeline_mode<synchronous>, transform_indices = @transform_11, window_bounds = array<i64: 1, 32>}, {pipeline_mode = #tpu.pipeline_mode<synchronous>, transform_indices = @transform_12, window_bounds = array<i64: 1, 32>}, {pipeline_mode = #tpu.pipeline_mode<synchronous>, transform_indices = @transform_13, window_bounds = array<i64: 32, 128>}, {pipeline_mode = #tpu.pipeline_mode<synchronous>, transform_indices = @transform_14, window_bounds = array<i64: 1, 128>}, {pipeline_mode = #tpu.pipeline_mode<synchronous>, transform_indices = @transform_15, window_bounds = array<i64: 128, 32>}, {pipeline_mode = #tpu.pipeline_mode<synchronous>, transform_indices = @transform_16, window_bounds = array<i64: 1, 32>}, {pipeline_mode = #tpu.pipeline_mode<synchronous>, transform_indices = @transform_17, window_bounds = array<i64: 1, 32>}, {pipeline_mode = #tpu.pipeline_mode<synchronous>, transform_indices = @transform_18, window_bounds = array<i64: 1, 32>}, {transform_indices = @transform_19, window_bounds = array<i64: 16, 32>}]} {
    %c0 = arith.constant 0 : index
    %c0_0 = arith.constant 0 : index
    %c0_1 = arith.constant 0 : index
    %0 = vector.load %arg3[%c0, %c0_0, %c0_1] : memref<16x8x64xf32, #tpu.memory_space<vmem>>, vector<16x8x64xf32>
    %c0_i32 = arith.constant 0 : i32
    %1 = arith.cmpi eq, %arg1, %c0_i32 : i32
    %2 = arith.extui %1 : i1 to i32
    %c0_i32_2 = arith.constant 0 : i32
    %3 = arith.cmpi ne, %2, %c0_i32_2 : i32
    scf.if %3 {
      %cst_32 = arith.constant 0.000000e+00 : f32
      %50 = vector.broadcast %cst_32 : f32 to vector<16x32xf32>
      %c0_33 = arith.constant 0 : index
      %c0_34 = arith.constant 0 : index
      %51 = vector.load %arg22[%c0_33, %c0_34] : memref<16x32xf32, #tpu.memory_space<vmem>>, vector<16x32xf32>
      tpu.vector_store %arg22[%c0_33, %c0_34], %50 {strides = array<i32>} : memref<16x32xf32, #tpu.memory_space<vmem>>, vector<16x32xf32>,
      %c0_35 = arith.constant 0 : index
      %c0_36 = arith.constant 0 : index
      %52 = vector.load %arg2[%c0_35, %c0_36] : memref<16x32xf32, #tpu.memory_space<vmem>>, vector<16x32xf32>
      %c0_37 = arith.constant 0 : index
      %c0_38 = arith.constant 0 : index
      %53 = vector.load %arg6[%c0_37, %c0_38] : memref<32x32xf32, #tpu.memory_space<vmem>>, vector<32x32xf32>
      %cst_39 = arith.constant dense<0.000000e+00> : vector<16x32xf32>
      %54 = tpu.matmul %52, %53, %cst_39 {dimension_numbers = #tpu.dot_dimension_numbers<[1], [0], [0], [1], [0, 0, 1, 1], [], []>} : vector<16x32xf32>, vector<32x32xf32>, vector<16x32xf32> -> vector<16x32xf32>
      %c0_40 = arith.constant 0 : index
      %c0_41 = arith.constant 0 : index
      %55 = vector.load %arg8[%c0_40, %c0_41] : memref<1x32xf32, #tpu.memory_space<vmem>>, vector<1x32xf32>
      %56 = vector.broadcast %55 : vector<1x32xf32> to vector<16x32xf32>
      %57 = arith.addf %54, %56 : vector<16x32xf32>
      %c0_42 = arith.constant 0 : index
      %c0_43 = arith.constant 0 : index
      %58 = vector.load %arg23[%c0_42, %c0_43] : memref<16x32xf32, #tpu.memory_space<vmem>>, vector<16x32xf32>
      tpu.vector_store %arg23[%c0_42, %c0_43], %57 {strides = array<i32>} : memref<16x32xf32, #tpu.memory_space<vmem>>, vector<16x32xf32>,
    } else {
    }
    %4 = vector.shape_cast %0 : vector<16x8x64xf32> to vector<128x64xf32>
    %c0_3 = arith.constant 0 : index
    %c0_4 = arith.constant 0 : index
    %5 = vector.load %arg7[%c0_3, %c0_4] : memref<64x32xf32, #tpu.memory_space<vmem>>, vector<64x32xf32>
    %cst = arith.constant dense<0.000000e+00> : vector<128x32xf32>
    %6 = tpu.matmul %4, %5, %cst {dimension_numbers = #tpu.dot_dimension_numbers<[1], [0], [0], [1], [0, 0, 1, 1], [], []>} : vector<128x64xf32>, vector<64x32xf32>, vector<128x32xf32> -> vector<128x32xf32>
    %7 = vector.shape_cast %6 : vector<128x32xf32> to vector<16x8x32xf32>
    %c0_5 = arith.constant 0 : index
    %c0_6 = arith.constant 0 : index
    %8 = vector.load %arg23[%c0_5, %c0_6] : memref<16x32xf32, #tpu.memory_space<vmem>>, vector<16x32xf32>
    %9 = vector.shape_cast %8 : vector<16x32xf32> to vector<16x1x32xf32>
    %10 = vector.broadcast %9 : vector<16x1x32xf32> to vector<16x8x32xf32>
    %11 = arith.addf %7, %10 : vector<16x8x32xf32>
    %cst_7 = arith.constant 5.000000e-01 : f32
    %12 = vector.broadcast %cst_7 : f32 to vector<16x8x32xf32>
    %13 = arith.mulf %12, %11 : vector<16x8x32xf32>
    %cst_8 = arith.constant 0.707106769 : f32
    %14 = vector.broadcast %cst_8 : f32 to vector<16x8x32xf32>
    %15 = arith.mulf %11, %14 : vector<16x8x32xf32>
    %16 = math.erf %15 : vector<16x8x32xf32>
    %cst_9 = arith.constant 1.000000e+00 : f32
    %17 = vector.broadcast %cst_9 : f32 to vector<16x8x32xf32>
    %18 = arith.addf %17, %16 : vector<16x8x32xf32>
    %19 = arith.mulf %13, %18 : vector<16x8x32xf32>
    %20 = vector.shape_cast %19 : vector<16x8x32xf32> to vector<128x32xf32>
    %c0_10 = arith.constant 0 : index
    %c0_11 = arith.constant 0 : index
    %21 = vector.load %arg9[%c0_10, %c0_11] : memref<32x32xf32, #tpu.memory_space<vmem>>, vector<32x32xf32>
    %cst_12 = arith.constant dense<0.000000e+00> : vector<128x32xf32>
    %22 = tpu.matmul %20, %21, %cst_12 {dimension_numbers = #tpu.dot_dimension_numbers<[1], [0], [0], [1], [0, 0, 1, 1], [], []>} : vector<128x32xf32>, vector<32x32xf32>, vector<128x32xf32> -> vector<128x32xf32>
    %c0_13 = arith.constant 0 : index
    %c0_14 = arith.constant 0 : index
    %23 = vector.load %arg10[%c0_13, %c0_14] : memref<1x32xf32, #tpu.memory_space<vmem>>, vector<1x32xf32>
    %24 = vector.broadcast %23 : vector<1x32xf32> to vector<128x32xf32>
    %25 = arith.addf %22, %24 : vector<128x32xf32>
    %cst_15 = arith.constant 5.000000e-01 : f32
    %26 = vector.broadcast %cst_15 : f32 to vector<128x32xf32>
    %27 = arith.mulf %26, %25 : vector<128x32xf32>
    %cst_16 = arith.constant 0.707106769 : f32
    %28 = vector.broadcast %cst_16 : f32 to vector<128x32xf32>
    %29 = arith.mulf %25, %28 : vector<128x32xf32>
    %30 = math.erf %29 : vector<128x32xf32>
    %cst_17 = arith.constant 1.000000e+00 : f32
    %31 = vector.broadcast %cst_17 : f32 to vector<128x32xf32>
    %32 = arith.addf %31, %30 : vector<128x32xf32>
    %33 = arith.mulf %27, %32 : vector<128x32xf32>
    %c0_18 = arith.constant 0 : index
    %c0_19 = arith.constant 0 : index
    %34 = vector.load %arg11[%c0_18, %c0_19] : memref<32x32xf32, #tpu.memory_space<vmem>>, vector<32x32xf32>
    %cst_20 = arith.constant dense<0.000000e+00> : vector<128x32xf32>
    %35 = tpu.matmul %33, %34, %cst_20 {dimension_numbers = #tpu.dot_dimension_numbers<[1], [0], [0], [1], [0, 0, 1, 1], [], []>} : vector<128x32xf32>, vector<32x32xf32>, vector<128x32xf32> -> vector<128x32xf32>
    %c0_21 = arith.constant 0 : index
    %c0_22 = arith.constant 0 : index
    %36 = vector.load %arg12[%c0_21, %c0_22] : memref<1x32xf32, #tpu.memory_space<vmem>>, vector<1x32xf32>
    %37 = vector.broadcast %36 : vector<1x32xf32> to vector<128x32xf32>
    %38 = arith.addf %35, %37 : vector<128x32xf32>
    %39 = vector.shape_cast %38 : vector<128x32xf32> to vector<16x8x32xf32>
    %c0_23 = arith.constant 0 : index
    %c0_24 = arith.constant 0 : index
    %c0_25 = arith.constant 0 : index
    %40 = vector.load %arg4[%c0_23, %c0_24, %c0_25] : memref<16x8x1xf32, #tpu.memory_space<vmem>>, vector<16x8x1xf32>
    %41 = vector.broadcast %40 : vector<16x8x1xf32> to vector<16x8x32xf32>
    %42 = arith.mulf %39, %41 : vector<16x8x32xf32>
    %c0_26 = arith.constant 0 : index
    %c0_27 = arith.constant 0 : index
    %43 = vector.load %arg22[%c0_26, %c0_27] : memref<16x32xf32, #tpu.memory_space<vmem>>, vector<16x32xf32>
    %cst_28 = arith.constant dense<0.000000e+00> : vector<16x32xf32>
    %44 = vector.multi_reduction <add>, %42, %cst_28 [1] : vector<16x8x32xf32> to vector<16x32xf32>
    %45 = arith.addf %43, %44 : vector<16x32xf32>
    %c0_29 = arith.constant 0 : index
    %c0_30 = arith.constant 0 : index
    %46 = vector.load %arg22[%c0_29, %c0_30] : memref<16x32xf32, #tpu.memory_space<vmem>>, vector<16x32xf32>
    tpu.vector_store %arg22[%c0_29, %c0_30], %45 {strides = array<i32>} : memref<16x32xf32, #tpu.memory_space<vmem>>, vector<16x32xf32>,
    %c1_i32 = arith.constant 1 : i32
    %47 = arith.cmpi eq, %arg1, %c1_i32 : i32
    %48 = arith.extui %47 : i1 to i32
    %c0_i32_31 = arith.constant 0 : i32
    %49 = arith.cmpi ne, %48, %c0_i32_31 : i32
    scf.if %49 {
      %c0_32 = arith.constant 0 : index
      %c0_33 = arith.constant 0 : index
      %50 = vector.load %arg2[%c0_32, %c0_33] : memref<16x32xf32, #tpu.memory_space<vmem>>, vector<16x32xf32>
      %c0_34 = arith.constant 0 : index
      %c0_35 = arith.constant 0 : index
      %51 = vector.load %arg22[%c0_34, %c0_35] : memref<16x32xf32, #tpu.memory_space<vmem>>, vector<16x32xf32>
      %52 = arith.addf %50, %51 : vector<16x32xf32>
      %c0_36 = arith.constant 0 : index
      %c0_37 = arith.constant 0 : index
      %53 = vector.load %arg13[%c0_36, %c0_37] : memref<1x32xf32, #tpu.memory_space<vmem>>, vector<1x32xf32>
      %c0_38 = arith.constant 0 : index
      %c0_39 = arith.constant 0 : index
      %54 = vector.load %arg14[%c0_38, %c0_39] : memref<1x32xf32, #tpu.memory_space<vmem>>, vector<1x32xf32>
      %cst_40 = arith.constant dense<0.000000e+00> : vector<16xf32>
      %55 = vector.multi_reduction <add>, %52, %cst_40 [1] : vector<16x32xf32> to vector<16xf32>
      %56 = vector.shape_cast %55 : vector<16xf32> to vector<16x1xf32>
      %cst_41 = arith.constant 3.200000e+01 : f32
      %57 = vector.broadcast %cst_41 : f32 to vector<16x1xf32>
      %58 = arith.divf %56, %57 : vector<16x1xf32>
      %59 = vector.broadcast %58 : vector<16x1xf32> to vector<16x32xf32>
      %60 = arith.subf %52, %59 : vector<16x32xf32>
      %61 = arith.mulf %60, %60 : vector<16x32xf32>
      %cst_42 = arith.constant dense<0.000000e+00> : vector<16xf32>
      %62 = vector.multi_reduction <add>, %61, %cst_42 [1] : vector<16x32xf32> to vector<16xf32>
      %63 = vector.shape_cast %62 : vector<16xf32> to vector<16x1xf32>
      %cst_43 = arith.constant 3.200000e+01 : f32
      %64 = vector.broadcast %cst_43 : f32 to vector<16x1xf32>
      %65 = arith.divf %63, %64 : vector<16x1xf32>
      %66 = vector.broadcast %58 : vector<16x1xf32> to vector<16x32xf32>
      %67 = arith.subf %52, %66 : vector<16x32xf32>
      %cst_44 = arith.constant 9.99999974E-6 : f32
      %68 = vector.broadcast %cst_44 : f32 to vector<16x1xf32>
      %69 = arith.addf %65, %68 : vector<16x1xf32>
      %70 = math.rsqrt %69 : vector<16x1xf32>
      %71 = vector.broadcast %70 : vector<16x1xf32> to vector<16x32xf32>
      %72 = arith.mulf %67, %71 : vector<16x32xf32>
      %73 = vector.broadcast %53 : vector<1x32xf32> to vector<16x32xf32>
      %74 = arith.mulf %72, %73 : vector<16x32xf32>
      %75 = vector.broadcast %54 : vector<1x32xf32> to vector<16x32xf32>
      %76 = arith.addf %74, %75 : vector<16x32xf32>
      %c0_45 = arith.constant 0 : index
      %c0_46 = arith.constant 0 : index
      %77 = vector.load %arg15[%c0_45, %c0_46] : memref<32x128xf32, #tpu.memory_space<vmem>>, vector<32x128xf32>
      %cst_47 = arith.constant dense<0.000000e+00> : vector<16x128xf32>
      %78 = tpu.matmul %76, %77, %cst_47 {dimension_numbers = #tpu.dot_dimension_numbers<[1], [0], [0], [1], [0, 0, 1, 1], [], []>} : vector<16x32xf32>, vector<32x128xf32>, vector<16x128xf32> -> vector<16x128xf32>
      %c0_48 = arith.constant 0 : index
      %c0_49 = arith.constant 0 : index
      %79 = vector.load %arg16[%c0_48, %c0_49] : memref<1x128xf32, #tpu.memory_space<vmem>>, vector<1x128xf32>
      %80 = vector.broadcast %79 : vector<1x128xf32> to vector<16x128xf32>
      %81 = arith.addf %78, %80 : vector<16x128xf32>
      %cst_50 = arith.constant 5.000000e-01 : f32
      %82 = vector.broadcast %cst_50 : f32 to vector<16x128xf32>
      %83 = arith.mulf %82, %81 : vector<16x128xf32>
      %cst_51 = arith.constant 0.707106769 : f32
      %84 = vector.broadcast %cst_51 : f32 to vector<16x128xf32>
      %85 = arith.mulf %81, %84 : vector<16x128xf32>
      %86 = math.erf %85 : vector<16x128xf32>
      %cst_52 = arith.constant 1.000000e+00 : f32
      %87 = vector.broadcast %cst_52 : f32 to vector<16x128xf32>
      %88 = arith.addf %87, %86 : vector<16x128xf32>
      %89 = arith.mulf %83, %88 : vector<16x128xf32>
      %c0_53 = arith.constant 0 : index
      %c0_54 = arith.constant 0 : index
      %90 = vector.load %arg17[%c0_53, %c0_54] : memref<128x32xf32, #tpu.memory_space<vmem>>, vector<128x32xf32>
      %cst_55 = arith.constant dense<0.000000e+00> : vector<16x32xf32>
      %91 = tpu.matmul %89, %90, %cst_55 {dimension_numbers = #tpu.dot_dimension_numbers<[1], [0], [0], [1], [0, 0, 1, 1], [], []>} : vector<16x128xf32>, vector<128x32xf32>, vector<16x32xf32> -> vector<16x32xf32>
      %c0_56 = arith.constant 0 : index
      %c0_57 = arith.constant 0 : index
      %92 = vector.load %arg18[%c0_56, %c0_57] : memref<1x32xf32, #tpu.memory_space<vmem>>, vector<1x32xf32>
      %93 = vector.broadcast %92 : vector<1x32xf32> to vector<16x32xf32>
      %94 = arith.addf %91, %93 : vector<16x32xf32>
      %95 = arith.addf %76, %94 : vector<16x32xf32>
      %c0_58 = arith.constant 0 : index
      %c0_59 = arith.constant 0 : index
      %96 = vector.load %arg19[%c0_58, %c0_59] : memref<1x32xf32, #tpu.memory_space<vmem>>, vector<1x32xf32>
      %c0_60 = arith.constant 0 : index
      %c0_61 = arith.constant 0 : index
      %97 = vector.load %arg20[%c0_60, %c0_61] : memref<1x32xf32, #tpu.memory_space<vmem>>, vector<1x32xf32>
      %cst_62 = arith.constant dense<0.000000e+00> : vector<16xf32>
      %98 = vector.multi_reduction <add>, %95, %cst_62 [1] : vector<16x32xf32> to vector<16xf32>
      %99 = vector.shape_cast %98 : vector<16xf32> to vector<16x1xf32>
      %cst_63 = arith.constant 3.200000e+01 : f32
      %100 = vector.broadcast %cst_63 : f32 to vector<16x1xf32>
      %101 = arith.divf %99, %100 : vector<16x1xf32>
      %102 = vector.broadcast %101 : vector<16x1xf32> to vector<16x32xf32>
      %103 = arith.subf %95, %102 : vector<16x32xf32>
      %104 = arith.mulf %103, %103 : vector<16x32xf32>
      %cst_64 = arith.constant dense<0.000000e+00> : vector<16xf32>
      %105 = vector.multi_reduction <add>, %104, %cst_64 [1] : vector<16x32xf32> to vector<16xf32>
      %106 = vector.shape_cast %105 : vector<16xf32> to vector<16x1xf32>
      %cst_65 = arith.constant 3.200000e+01 : f32
      %107 = vector.broadcast %cst_65 : f32 to vector<16x1xf32>
      %108 = arith.divf %106, %107 : vector<16x1xf32>
      %109 = vector.broadcast %101 : vector<16x1xf32> to vector<16x32xf32>
      %110 = arith.subf %95, %109 : vector<16x32xf32>
      %cst_66 = arith.constant 9.99999974E-6 : f32
      %111 = vector.broadcast %cst_66 : f32 to vector<16x1xf32>
      %112 = arith.addf %108, %111 : vector<16x1xf32>
      %113 = math.rsqrt %112 : vector<16x1xf32>
      %114 = vector.broadcast %113 : vector<16x1xf32> to vector<16x32xf32>
      %115 = arith.mulf %110, %114 : vector<16x32xf32>
      %116 = vector.broadcast %96 : vector<1x32xf32> to vector<16x32xf32>
      %117 = arith.mulf %115, %116 : vector<16x32xf32>
      %118 = vector.broadcast %97 : vector<1x32xf32> to vector<16x32xf32>
      %119 = arith.addf %117, %118 : vector<16x32xf32>
      %c0_67 = arith.constant 0 : index
      %c0_68 = arith.constant 0 : index
      %120 = vector.load %arg5[%c0_67, %c0_68] : memref<16x1xf32, #tpu.memory_space<vmem>>, vector<16x1xf32>
      %121 = vector.broadcast %120 : vector<16x1xf32> to vector<16x32xf32>
      %122 = arith.mulf %119, %121 : vector<16x32xf32>
      %c0_69 = arith.constant 0 : index
      %c0_70 = arith.constant 0 : index
      %123 = vector.load %arg21[%c0_69, %c0_70] : memref<16x32xf32, #tpu.memory_space<vmem>>, vector<16x32xf32>
      tpu.vector_store %arg21[%c0_69, %c0_70], %122 {strides = array<i32>} : memref<16x32xf32, #tpu.memory_space<vmem>>, vector<16x32xf32>,
    } else {
    }
    return
  }
  func.func @transform_0(%arg0: i32, %arg1: i32) -> (i32, i32) {
    %c0_i32 = arith.constant 0 : i32
    %c0_i32_0 = arith.constant 0 : i32
    return %arg0, %c0_i32 : i32, i32
  }
  func.func @transform_1(%arg0: i32, %arg1: i32) -> (i32, i32, i32) {
    %c0_i32 = arith.constant 0 : i32
    %c0_i32_0 = arith.constant 0 : i32
    return %arg0, %arg1, %c0_i32 : i32, i32, i32
  }
  func.func @transform_2(%arg0: i32, %arg1: i32) -> (i32, i32, i32) {
    %c0_i32 = arith.constant 0 : i32
    %c0_i32_0 = arith.constant 0 : i32
    return %arg0, %arg1, %c0_i32 : i32, i32, i32
  }
  func.func @transform_3(%arg0: i32, %arg1: i32) -> (i32, i32) {
    %c0_i32 = arith.constant 0 : i32
    %c0_i32_0 = arith.constant 0 : i32
    return %arg0, %c0_i32 : i32, i32
  }
  func.func @transform_4(%arg0: i32, %arg1: i32) -> (i32, i32) {
    %c0_i32 = arith.constant 0 : i32
    %c0_i32_0 = arith.constant 0 : i32
    %c0_i32_1 = arith.constant 0 : i32
    return %c0_i32, %c0_i32_0 : i32, i32
  }
  func.func @transform_5(%arg0: i32, %arg1: i32) -> (i32, i32) {
    %c0_i32 = arith.constant 0 : i32
    %c0_i32_0 = arith.constant 0 : i32
    %c0_i32_1 = arith.constant 0 : i32
    return %c0_i32, %c0_i32_0 : i32, i32
  }
  func.func @transform_6(%arg0: i32, %arg1: i32) -> (i32, i32) {
    %c0_i32 = arith.constant 0 : i32
    %c0_i32_0 = arith.constant 0 : i32
    %c0_i32_1 = arith.constant 0 : i32
    return %c0_i32, %c0_i32_0 : i32, i32
  }
  func.func @transform_7(%arg0: i32, %arg1: i32) -> (i32, i32) {
    %c0_i32 = arith.constant 0 : i32
    %c0_i32_0 = arith.constant 0 : i32
    %c0_i32_1 = arith.constant 0 : i32
    return %c0_i32, %c0_i32_0 : i32, i32
  }
  func.func @transform_8(%arg0: i32, %arg1: i32) -> (i32, i32) {
    %c0_i32 = arith.constant 0 : i32
    %c0_i32_0 = arith.constant 0 : i32
    %c0_i32_1 = arith.constant 0 : i32
    return %c0_i32, %c0_i32_0 : i32, i32
  }
  func.func @transform_9(%arg0: i32, %arg1: i32) -> (i32, i32) {
    %c0_i32 = arith.constant 0 : i32
    %c0_i32_0 = arith.constant 0 : i32
    %c0_i32_1 = arith.constant 0 : i32
    return %c0_i32, %c0_i32_0 : i32, i32
  }
  func.func @transform_10(%arg0: i32, %arg1: i32) -> (i32, i32) {
    %c0_i32 = arith.constant 0 : i32
    %c0_i32_0 = arith.constant 0 : i32
    %c0_i32_1 = arith.constant 0 : i32
    return %c0_i32, %c0_i32_0 : i32, i32
  }
  func.func @transform_11(%arg0: i32, %arg1: i32) -> (i32, i32) {
    %c0_i32 = arith.constant 0 : i32
    %c0_i32_0 = arith.constant 0 : i32
    %c0_i32_1 = arith.constant 0 : i32
    return %c0_i32, %c0_i32_0 : i32, i32
  }
  func.func @transform_12(%arg0: i32, %arg1: i32) -> (i32, i32) {
    %c0_i32 = arith.constant 0 : i32
    %c0_i32_0 = arith.constant 0 : i32
    %c0_i32_1 = arith.constant 0 : i32
    return %c0_i32, %c0_i32_0 : i32, i32
  }
  func.func @transform_13(%arg0: i32, %arg1: i32) -> (i32, i32) {
    %c0_i32 = arith.constant 0 : i32
    %c0_i32_0 = arith.constant 0 : i32
    %c0_i32_1 = arith.constant 0 : i32
    return %c0_i32, %c0_i32_0 : i32, i32
  }
  func.func @transform_14(%arg0: i32, %arg1: i32) -> (i32, i32) {
    %c0_i32 = arith.constant 0 : i32
    %c0_i32_0 = arith.constant 0 : i32
    %c0_i32_1 = arith.constant 0 : i32
    return %c0_i32, %c0_i32_0 : i32, i32
  }
  func.func @transform_15(%arg0: i32, %arg1: i32) -> (i32, i32) {
    %c0_i32 = arith.constant 0 : i32
    %c0_i32_0 = arith.constant 0 : i32
    %c0_i32_1 = arith.constant 0 : i32
    return %c0_i32, %c0_i32_0 : i32, i32
  }
  func.func @transform_16(%arg0: i32, %arg1: i32) -> (i32, i32) {
    %c0_i32 = arith.constant 0 : i32
    %c0_i32_0 = arith.constant 0 : i32
    %c0_i32_1 = arith.constant 0 : i32
    return %c0_i32, %c0_i32_0 : i32, i32
  }
  func.func @transform_17(%arg0: i32, %arg1: i32) -> (i32, i32) {
    %c0_i32 = arith.constant 0 : i32
    %c0_i32_0 = arith.constant 0 : i32
    %c0_i32_1 = arith.constant 0 : i32
    return %c0_i32, %c0_i32_0 : i32, i32
  }
  func.func @transform_18(%arg0: i32, %arg1: i32) -> (i32, i32) {
    %c0_i32 = arith.constant 0 : i32
    %c0_i32_0 = arith.constant 0 : i32
    %c0_i32_1 = arith.constant 0 : i32
    return %c0_i32, %c0_i32_0 : i32, i32
  }
  func.func @transform_19(%arg0: i32, %arg1: i32) -> (i32, i32) {
    %c0_i32 = arith.constant 0 : i32
    %c0_i32_0 = arith.constant 0 : i32
    return %arg0, %c0_i32 : i32, i32
  }
}

</mosaic_0001>

<bundles_post_ra>
// kernel: tpu_custom_call.1
= control target key start
LH: loop header
LB: loop body
LE: loop exit
PB: predicated region body
PF: predicated region fallthrough
CT: control target
= control target key end

     0   :  { %s4896_s0 = inlined_call_operand.vmem [shape: f32[20,32], index: 0, kind: input, shape index: {}]   ;;  %s4897_s1 = inlined_call_operand.vmem [shape: f32[20,16,64], index: 1, kind: input, shape index: {}]   ;;  %s4898_s2 = inlined_call_operand.vmem [shape: f32[20,16,1], index: 2, kind: input, shape index: {}]   ;;  %s4899_s3 = inlined_call_operand.vmem [shape: f32[20,1], index: 3, kind: input, shape index: {}]   ;;  %s4900_s4 = inlined_call_operand.vmem [shape: f32[32,32], index: 4, kind: input, shape index: {}]   ;;  %s4901_s5 = inlined_call_operand.vmem [shape: f32[64,32], index: 5, kind: input, shape index: {}]   ;;  %s4902_s6 = inlined_call_operand.vmem [shape: f32[1,32], index: 6, kind: input, shape index: {}]   ;;  %s4903_s7 = inlined_call_operand.vmem [shape: f32[32,32], index: 7, kind: input, shape index: {}]   ;;  %s4904_s8 = inlined_call_operand.vmem [shape: f32[1,32], index: 8, kind: input, shape index: {}]   ;;  %s4905_s9 = inlined_call_operand.vmem [shape: f32[32,32], index: 9, kind: input, shape index: {}]   ;;  %s4906_s10 = inlined_call_operand.vmem [shape: f32[1,32], index: 10, kind: input, shape index: {}]   ;;  %s4907_s11 = inlined_call_operand.vmem [shape: f32[1,32], index: 11, kind: input, shape index: {}]   ;;  %s4908_s12 = inlined_call_operand.vmem [shape: f32[1,32], index: 12, kind: input, shape index: {}]   ;;  %s4909_s13 = inlined_call_operand.vmem [shape: f32[32,128], index: 13, kind: input, shape index: {}]   ;;  %s4910_s14 = inlined_call_operand.vmem [shape: f32[1,128], index: 14, kind: input, shape index: {}]   ;;  %s4911_s15 = inlined_call_operand.vmem [shape: f32[128,32], index: 15, kind: input, shape index: {}]   ;;  %s4912_s16 = inlined_call_operand.vmem [shape: f32[1,32], index: 16, kind: input, shape index: {}]   ;;  %s4913_s17 = inlined_call_operand.vmem [shape: f32[1,32], index: 17, kind: input, shape index: {}]   ;;  %s4914_s18 = inlined_call_operand.vmem [shape: f32[1,32], index: 18, kind: input, shape index: {}]   ;;  %s4915_s19 = inlined_call_operand.hbm [shape: f32[20,32], index: 19, kind: output, shape index: {}]  }
   0x1   :  { %4925 = sst [smem:[#allocation17_spill]] %s4896_s0 }
   0x2   :  { %4926 = sst [smem:[#allocation18_spill]] %s4897_s1 }
   0x3   :  { %4927 = sst [smem:[#allocation19_spill]] %s4898_s2 }
   0x4   :  { %4928 = sst [smem:[#allocation20_spill]] %s4899_s3 }
   0x5   :  { %4929 = sst [smem:[#allocation21_spill]] %s4907_s11 }
   0x6   :  { %4930 = sst [smem:[#allocation22_spill]] %s4908_s12 }
   0x7   :  { %4931 = sst [smem:[#allocation23_spill]] %s4909_s13 }
   0x8   :  { %4932 = sst [smem:[#allocation24_spill]] %s4910_s14 }
   0x9   :  { %4933 = sst [smem:[#allocation25_spill]] %s4911_s15 }
   0xa   :  { %4934 = sst [smem:[#allocation26_spill]] %s4912_s16 }
   0xb   :  { %4935 = sst [smem:[#allocation27_spill]] %s4913_s17 }
   0xc   :  { %4936 = sst [smem:[#allocation28_spill]] %s4914_s18 }
   0xd   :  { %4937 = sst [smem:[#allocation29_spill]] %s4915_s19 }
   0xe   :  { %24 = vsyncpa [#allocation7], 0 }
   0xf   :  { %26 = vsyncpa [#allocation7 + $0x1], 0  ;;  %s4028_s0 = smov 0   ;;  %s4030_s30 = smov 0  }
  0x10   :  { %s4032_s20 = smov 0   ;;  %s4034_s21 = smov 0  }
  0x11   :  { %s4036_s1 = smov 0   ;;  %s4038_s22 = smov 0  }
  0x12   :  { %s4040_s2 = smov 0   ;;  %s4042_s23 = smov 0  }
  0x13   :  { %s4044_s24 = smov 0   ;;  %s4046_s25 = smov 0  }
  0x14 LB: > { %4938 = sst [smem:[#allocation9_spill]] %s3819_s0  ;;  %s2995_s3 = sadd.s32 4294967295, %s3855_s25   ;;  %s3855_s25 = sphi %s4046_s25, %s32_s25   ;;  %s3851_s24 = sphi %s4044_s24, %s4983_s24   ;;  %s3847_s23 = sphi %s4042_s23, %s4982_s23   ;;  %s3843_s2 = sphi %s4040_s2, %s4981_s2   ;;  %s3839_s22 = sphi %s4038_s22, %s4980_s22   ;;  %s3835_s1 = sphi %s4036_s1, %s4979_s1   ;;  %s3831_s21 = sphi %s4034_s21, %s4978_s21   ;;  %s3827_s20 = sphi %s4032_s20, %s4972_s20   ;;  %s3823_s30 = sphi %s4030_s30, %s4977_s30   ;;  %s3819_s0 = sphi %s4028_s0, %s4976_s0  }
  0x15   : > { %4939 = sst [smem:[#allocation10_spill]] %s3827_s20  ;;  %s2996_s26 = sadd.s32 4294967294, %s3855_s25  }
  0x16   : > { %s41_s27 = sadd.s32 1, %s3847_s23  ;;  %s44_s28 = sadd.s32 1, %s3851_s24 }
  0x17   : > { %p42_p0 = scmp.ge.s32.totalorder %s41_s27, 2  ;;  %s79_s29 = sadd.s32 1, %s3835_s1 }
  0x18   : > { %p86_p1 = scmp.ne.s32.totalorder %s3835_s1, %s3831_s21  ;;  %p87_p2 = scmp.eq.s32.totalorder %s3855_s25, 0 }
  0x19   : > { %s4985_s27 = smov (%p42_p0, %s41_s27), 0  ;;  %s4987_s28 = smov (!%p42_p0, %s44_s28), %s3851_s24 }
  0x1a   : > { %4940 = sst [smem:[#allocation11_spill]] %s4985_s27  ;;  %s75_s19 = ssub.s32 %s3847_s23, %s4985_s27 }
  0x1b   : > { %p4091_p3 = por %p87_p2, %p86_p1  ;;  %p46_p4 = scmp.ge.s32.totalorder %s4987_s28, 2 }
  0x1c   : > { %s474_s17 = sadd.s32 1, %s3827_s20  ;;  %p484_p5 = scmp.ne.s32.totalorder %s3827_s20, %s3823_s30 }
  0x1d   : > { %p485_p6 = scmp.eq.s32.totalorder %s2995_s3, 3  ;;  %s4989_s28 = smov (%p46_p4, %s4987_s28), 0 }
  0x1e   : > { %4942 = sst [smem:[#allocation12_spill]] %s4989_s28  ;;  %p490_p8 = scmp.ne.s32.totalorder %s3823_s30, %s3819_s0 }
  0x1f   : > { %p4100_p7 = por %p485_p6, %p484_p5  ;;  %s74_s14 = ssub.s32 %s3851_s24, %s4989_s28 }
  0x20   : > { %p491_p9 = scmp.eq.s32.totalorder %s2996_s26, 3  ;;  %s76_s27 = sor.u32 %s75_s19, %s74_s14 }
  0x21   : > { %s4943_s16 = scalar_select %p4100_p7, 1, 0 }
  0x22   : > { %p472_p10 = scmp.eq.s32.totalorder %s74_s14, 0  ;;  %p77_p11 = scmp.eq.s32.totalorder %s76_s27, 0 }
  0x23   : > { %4944 = sst [smem:[#allocation13_spill]] %s4943_s16  ;;  %p4108_p12 = por %p491_p9, %p490_p8 }
  0x24   : > { %s4113_s11 = scalar_select %p472_p10, %s3827_s20, %s474_s17  }
  0x25   : > { %s4945_s12 = scalar_select %p4108_p12, 1, 0 }
  0x26   : > { %4947 = sst [smem:[#allocation15_spill]] %s4113_s11  ;;  %p2998_p13 = scmp.ge.s32.totalorder %s3855_s25, 4 }
  0x27   : > { %4946 = sst [smem:[#allocation14_spill]] %s4945_s12 }
  0x28   : > { %s4116_s3 = scalar_select %p77_p11, %s3835_s1, %s79_s29  }
  0x29   : > { %552 = sbr.rel (%p2998_p13) target bundleno = 138 (0x8a), region = 76 }
  0x2a   : > { %4948 = sst [smem:[#allocation16_spill]] %s4116_s3 }
  0x2e   : > { %572 = sbr.rel (!%p4091_p3) target bundleno = 92 (0x5c), region = 84  ;;  %s574_s14 = sand.u32 (%p4091_p3), 1, %s3835_s1  }
  0x2f   : > { %s3000_s19 = sshll.u32 (%p4091_p3), %s3851_s24, 4  ;;  %s2999_s26 = sshll.u32 (%p4091_p3), %s574_s14, 7 }
  0x30   : > { %s578_s27 = ssub.s32 (%p4091_p3), 20, %s3000_s19  ;;  %s3111_s28 = sshll.u32 (%p4091_p3), %s3851_s24, 5 }
  0x31   : > { %p579_p0 = scmp.lt.s32.totalorder (%p4091_p3), %s578_s27, 16  ;;  %s584_s17 = sadd.s32 (%p4091_p3), %s3847_s23, %s3111_s28 }
  0x32   : > { %s3004_s3 = sshll.u32 (%p4091_p3), %s584_s17, 3  ;;  %s4949_s12 = sld [smem:[#allocation18_spill]] (%p4091_p3) }
  0x33   : > { %s4991_s27 = smov (!%p579_p0, %s578_s27), 16  ;;  %s4133_s16 = scalar_lea.vmem [#allocation4], %s2999_s26  }
  0x34   : > { %s3001_s29 = sshll.u32 %s4991_s27, 7 }
  0x35   : > { %p3005_p1 = scmp.eq.s32.totalorder %s3001_s29, 0 }
  0x36   : > { %s4136_s14 = sshrl.u32 (!%p3005_p1), %s4991_s27, 4 }
  0x37   : > { %589 = sbr.rel (%p3005_p1) target bundleno = 92 (0x5c), region = 88  ;;  %p3006_p2 = scmp.le.s32.totalorder (!%p3005_p1), %s4136_s14, 0 }
  0x38   : > { %s4131_s0 = scalar_lea.vmem %s4949_s12, %s3004_s3  }
  0x3c   : > { %2894 = sbr.rel (%p3006_p2) target bundleno = 75 (0x4b), region = 272  ;;  %s4950_s28 = smov (!%p3006_p2), %s4133_s16 }
  0x3d   : > { %s4951_s19 = smov (!%p3006_p2), %s4131_s0  ;;  %s4145_s17 = smov (!%p3006_p2), 0  }
  0x3e   : > { %s4147_s11 = smov (!%p3006_p2), 0  }
  0x41 LB: >> { %v682_v0 = vld [vmem:[%s3863_s19] sm:$0xff]  ;;  %v684_v1 = vld [vmem:[%s3863_s19 + $0x10] sm:$0xff]  ;;  %s714_s12 = sadd.s32 1, %s3867_s17  ;;  %s676_s11 = sadd.s32 1, %s3871_s11   ;;  %s3871_s11 = sphi %s4147_s11, %s676_s11   ;;  %s3867_s17 = sphi %s4145_s17, %s4952_s17   ;;  %s3863_s19 = sphi %s4951_s19, %s719_s19   ;;  %s3859_s28 = sphi %s4950_s28, %s720_s28  }
  0x42   : >> { %v686_v2 = vld [vmem:[%s3863_s19 + $0x20] sm:$0xff]  ;;  %683 = vst [vmem:[%s3859_s28] sm:$0xff] %v682_v0  ;;  %685 = vst [vmem:[%s3859_s28 + $0x8] sm:$0xff] %v684_v1  ;;  %v688_v3 = vld [vmem:[%s3863_s19 + $0x30] sm:$0xff]  ;;  %p715_p4 = scmp.ge.s32.totalorder %s714_s12, %s4136_s14  ;;  %p675_p5 = scmp.ge.s32.totalorder %s676_s11, %s4136_s14 }
  0x43   : >> { %687 = vst [vmem:[%s3859_s28 + $0x10] sm:$0xff] %v686_v2  ;;  %v690_v4 = vld [vmem:[%s3863_s19 + $0x40] sm:$0xff]  ;;  %v692_v5 = vld [vmem:[%s3863_s19 + $0x50] sm:$0xff]  ;;  %689 = vst [vmem:[%s3859_s28 + $0x18] sm:$0xff] %v688_v3 }
  0x44   : >> { %691 = vst [vmem:[%s3859_s28 + $0x20] sm:$0xff] %v690_v4  ;;  %693 = vst [vmem:[%s3859_s28 + $0x28] sm:$0xff] %v692_v5  ;;  %v694_v6 = vld [vmem:[%s3863_s19 + $0x60] sm:$0xff]  ;;  %v696_v7 = vld [vmem:[%s3863_s19 + $0x70] sm:$0xff]  ;;  %s4993_s12 = smov (%p715_p4, %s714_s12), 0 }
  0x45   : >> { %v698_v8 = vld [vmem:[%s3863_s19 + $0x80] sm:$0xff]  ;;  %695 = vst [vmem:[%s3859_s28 + $0x30] sm:$0xff] %v694_v6  ;;  %697 = vst [vmem:[%s3859_s28 + $0x38] sm:$0xff] %v696_v7  ;;  %v700_v9 = vld [vmem:[%s3863_s19 + $0x90] sm:$0xff]  ;;  %s3007_s20 = sshll.u32 %s4993_s12, 8  ;;  %s3008_s3 = sshll.u32 %s4993_s12, 7 }
  0x46   : >> { %699 = vst [vmem:[%s3859_s28 + $0x40] sm:$0xff] %v698_v8  ;;  %v702_v10 = vld [vmem:[%s3863_s19 + $0xa0] sm:$0xff]  ;;  %v704_v11 = vld [vmem:[%s3863_s19 + $0xb0] sm:$0xff]  ;;  %701 = vst [vmem:[%s3859_s28 + $0x48] sm:$0xff] %v700_v9  ;;  %s4952_s17 = smov %s4993_s12  ;;  %678 = sbr.rel (!%p675_p5) target bundleno = 65 (0x41), region = 278 }
  0x47   : >> { %703 = vst [vmem:[%s3859_s28 + $0x50] sm:$0xff] %v702_v10  ;;  %705 = vst [vmem:[%s3859_s28 + $0x58] sm:$0xff] %v704_v11  ;;  %v706_v12 = vld [vmem:[%s3863_s19 + $0xc0] sm:$0xff]  ;;  %v708_v13 = vld [vmem:[%s3863_s19 + $0xd0] sm:$0xff] }
  0x48   : >> { %v710_v14 = vld [vmem:[%s3863_s19 + $0xe0] sm:$0xff]  ;;  %707 = vst [vmem:[%s3859_s28 + $0x60] sm:$0xff] %v706_v12  ;;  %709 = vst [vmem:[%s3859_s28 + $0x68] sm:$0xff] %v708_v13  ;;  %v712_v15 = vld [vmem:[%s3863_s19 + $0xf0] sm:$0xff]  ;;  %s719_s19 = scalar_lea.vmem %s4131_s0, %s3007_s20  }
  0x49   : >> { %711 = vst [vmem:[%s3859_s28 + $0x70] sm:$0xff] %v710_v14  ;;  %713 = vst [vmem:[%s3859_s28 + $0x78] sm:$0xff] %v712_v15  ;;  %s720_s28 = scalar_lea.vmem %s4133_s16, %s3008_s3 [#allocation4]  }
  0x4b PF: > { %s4205_s26 = sand.u32 15, %s4991_s27   ;;  %s3112_s29 = sshll.u32 %s4136_s14, 8 }
  0x4c   : > { %s4209_s20 = scalar_lea.vmem %s4131_s0, %s3112_s29   ;;  %s3113_s3 = sshll.u32 %s4136_s14, 7 }
  0x4d   : > { %s727_s15 = scalar_lea.vmem %s4133_s16, %s3113_s3 [#allocation4]   ;;  %p3012_p6 = scmp.le.s32.totalorder %s4205_s26, 0 }
  0x4e   : > { %s3873_s12 = smov (!%p3012_p6), %s727_s15   ;;  %s3877_s11 = smov (!%p3012_p6), %s4209_s20  }
  0x4f   : > { %2908 = sbr.rel (%p3012_p6) target bundleno = 92 (0x5c), region = 283  ;;  %s3881_s13 = smov (!%p3012_p6), 0  }
  0x50   : > { %s3885_s28 = smov (!%p3012_p6), 0  }
  0x54 LB: >> { %v737_v16 = vld [vmem:[%s3879_s11] sm:$0xff]  ;;  %s739_s0 = sadd.s32 1, %s3883_s13  ;;  %s731_s28 = sadd.s32 1, %s3887_s28   ;;  %s3887_s28 = sphi %s3885_s28, %s731_s28   ;;  %s3883_s13 = sphi %s3881_s13, %s3882_s13   ;;  %s3879_s11 = sphi %s3877_s11, %s744_s11   ;;  %s3875_s12 = sphi %s3873_s12, %s745_s12  }
  0x55   : >> { %738 = vst [vmem:[%s3875_s12] sm:$0xff] %v737_v16  ;;  %p740_p8 = scmp.ge.s32.totalorder %s739_s0, %s4205_s26  ;;  %p730_p9 = scmp.ge.s32.totalorder %s731_s28, %s4205_s26 }
  0x57   : >> { %s4995_s0 = smov (%p740_p8, %s739_s0), 0  ;;  %733 = sbr.rel (!%p730_p9) target bundleno = 84 (0x54), region = 289 }
  0x58   : >> { %s3013_s16 = sshll.u32 %s4995_s0, 4  ;;  %s3014_s27 = sshll.u32 %s4995_s0, 3 }
  0x59   : >> { %s744_s11 = scalar_lea.vmem %s4209_s20, %s3013_s16   ;;  %s745_s12 = scalar_lea.vmem %s727_s15, %s3014_s27 [#allocation4]  }
  0x5a   : >> { %s3882_s13 = smov %s4995_s0  }
  0x5c PF: > { %751 = sbr.rel (!%p4091_p3) target bundleno = 138 (0x8a), region = 136  ;;  %s753_s13 = sand.u32 (%p4091_p3), 1, %s3835_s1  }
  0x5d   : > { %s3016_s14 = sshll.u32 (%p4091_p3), %s3851_s24, 4  ;;  %s3015_s19 = sshll.u32 (%p4091_p3), %s753_s13, 7 }
  0x5e   : > { %s757_s17 = ssub.s32 (%p4091_p3), 20, %s3016_s14  ;;  %s3114_s29 = sshll.u32 (%p4091_p3), %s3851_s24, 5 }
  0x5f   : > { %p758_p10 = scmp.lt.s32.totalorder (%p4091_p3), %s757_s17, 16  ;;  %s763_s3 = sadd.s32 (%p4091_p3), %s3847_s23, %s3114_s29 }
  0x60   : > { %s3020_s26 = sshll.u32 (%p4091_p3), %s763_s3, 3  ;;  %s4953_s18 = sld [smem:[#allocation19_spill]] (%p4091_p3) }
  0x61   : > { %s4997_s17 = smov (!%p758_p10, %s757_s17), 16  ;;  %s4232_s28 = scalar_lea.vmem [#allocation5], %s3015_s19  }
  0x62   : > { %s3017_s15 = sshll.u32 %s4997_s17, 7 }
  0x63   : > { %p3021_p3 = scmp.eq.s32.totalorder %s3017_s15, 0 }
  0x64   : > { %s4235_s0 = sshrl.u32 (!%p3021_p3), %s4997_s17, 4 }
  0x65   : > { %768 = sbr.rel (%p3021_p3) target bundleno = 138 (0x8a), region = 140  ;;  %p3022_p11 = scmp.le.s32.totalorder (!%p3021_p3), %s4235_s0, 0 }
  0x66   : > { %s4230_s11 = scalar_lea.vmem %s4953_s18, %s3020_s26  }
  0x6a   : > { %2922 = sbr.rel (%p3022_p11) target bundleno = 121 (0x79), region = 294  ;;  %s4954_s16 = smov (!%p3022_p11), %s4232_s28 }
  0x6b   : > { %s4955_s27 = smov (!%p3022_p11), %s4230_s11  ;;  %s4244_s13 = smov (!%p3022_p11), 0  }
  0x6c   : > { %s4246_s14 = smov (!%p3022_p11), 0  }
  0x6f LB: >> { %v861_v17 = vld [vmem:[%s3895_s27] sm:$0xff]  ;;  %v863_v18 = vld [vmem:[%s3895_s27 + $0x10] sm:$0xff]  ;;  %s893_s19 = sadd.s32 1, %s3899_s13  ;;  %s855_s14 = sadd.s32 1, %s3903_s14   ;;  %s3903_s14 = sphi %s4246_s14, %s855_s14   ;;  %s3899_s13 = sphi %s4244_s13, %s4956_s13   ;;  %s3895_s27 = sphi %s4955_s27, %s898_s27   ;;  %s3891_s16 = sphi %s4954_s16, %s899_s16  }
  0x70   : >> { %v865_v19 = vld [vmem:[%s3895_s27 + $0x20] sm:$0xff]  ;;  %862 = vst [vmem:[%s3891_s16] sm:$0xff] %v861_v17  ;;  %864 = vst [vmem:[%s3891_s16 + $0x8] sm:$0xff] %v863_v18  ;;  %v867_v20 = vld [vmem:[%s3895_s27 + $0x30] sm:$0xff]  ;;  %p894_p13 = scmp.ge.s32.totalorder %s893_s19, %s4235_s0  ;;  %p854_p0 = scmp.ge.s32.totalorder %s855_s14, %s4235_s0 }
  0x71   : >> { %866 = vst [vmem:[%s3891_s16 + $0x10] sm:$0xff] %v865_v19  ;;  %v869_v21 = vld [vmem:[%s3895_s27 + $0x40] sm:$0xff]  ;;  %v871_v22 = vld [vmem:[%s3895_s27 + $0x50] sm:$0xff]  ;;  %868 = vst [vmem:[%s3891_s16 + $0x18] sm:$0xff] %v867_v20 }
  0x72   : >> { %870 = vst [vmem:[%s3891_s16 + $0x20] sm:$0xff] %v869_v21  ;;  %872 = vst [vmem:[%s3891_s16 + $0x28] sm:$0xff] %v871_v22  ;;  %v873_v23 = vld [vmem:[%s3895_s27 + $0x60] sm:$0xff]  ;;  %v875_v24 = vld [vmem:[%s3895_s27 + $0x70] sm:$0xff]  ;;  %s4999_s19 = smov (%p894_p13, %s893_s19), 0 }
  0x73   : >> { %v877_v25 = vld [vmem:[%s3895_s27 + $0x80] sm:$0xff]  ;;  %874 = vst [vmem:[%s3891_s16 + $0x30] sm:$0xff] %v873_v23  ;;  %876 = vst [vmem:[%s3891_s16 + $0x38] sm:$0xff] %v875_v24  ;;  %v879_v26 = vld [vmem:[%s3895_s27 + $0x90] sm:$0xff]  ;;  %s3023_s29 = sshll.u32 %s4999_s19, 8  ;;  %s3024_s3 = sshll.u32 %s4999_s19, 7 }
  0x74   : >> { %878 = vst [vmem:[%s3891_s16 + $0x40] sm:$0xff] %v877_v25  ;;  %v881_v27 = vld [vmem:[%s3895_s27 + $0xa0] sm:$0xff]  ;;  %v883_v28 = vld [vmem:[%s3895_s27 + $0xb0] sm:$0xff]  ;;  %880 = vst [vmem:[%s3891_s16 + $0x48] sm:$0xff] %v879_v26  ;;  %s4956_s13 = smov %s4999_s19  ;;  %857 = sbr.rel (!%p854_p0) target bundleno = 111 (0x6f), region = 300 }
  0x75   : >> { %882 = vst [vmem:[%s3891_s16 + $0x50] sm:$0xff] %v881_v27  ;;  %884 = vst [vmem:[%s3891_s16 + $0x58] sm:$0xff] %v883_v28  ;;  %v885_v29 = vld [vmem:[%s3895_s27 + $0xc0] sm:$0xff]  ;;  %v887_v30 = vld [vmem:[%s3895_s27 + $0xd0] sm:$0xff] }
  0x76   : >> { %v889_v31 = vld [vmem:[%s3895_s27 + $0xe0] sm:$0xff]  ;;  %886 = vst [vmem:[%s3891_s16 + $0x60] sm:$0xff] %v885_v29  ;;  %888 = vst [vmem:[%s3891_s16 + $0x68] sm:$0xff] %v887_v30  ;;  %v891_v32 = vld [vmem:[%s3895_s27 + $0xf0] sm:$0xff]  ;;  %s898_s27 = scalar_lea.vmem %s4230_s11, %s3023_s29  }
  0x77   : >> { %890 = vst [vmem:[%s3891_s16 + $0x70] sm:$0xff] %v889_v31  ;;  %892 = vst [vmem:[%s3891_s16 + $0x78] sm:$0xff] %v891_v32  ;;  %s899_s16 = scalar_lea.vmem %s4232_s28, %s3024_s3 [#allocation5]  }
  0x79 PF: > { %s4304_s15 = sand.u32 15, %s4997_s17   ;;  %s3115_s26 = sshll.u32 %s4235_s0, 8 }
  0x7a   : > { %s4308_s20 = scalar_lea.vmem %s4230_s11, %s3115_s26   ;;  %s3116_s12 = sshll.u32 %s4235_s0, 7 }
  0x7b   : > { %s906_s18 = scalar_lea.vmem %s4232_s28, %s3116_s12 [#allocation5]   ;;  %p3028_p1 = scmp.le.s32.totalorder %s4304_s15, 0 }
  0x7c   : > { %s3905_s19 = smov (!%p3028_p1), %s906_s18   ;;  %s3909_s14 = smov (!%p3028_p1), %s4308_s20  }
  0x7d   : > { %2936 = sbr.rel (%p3028_p1) target bundleno = 138 (0x8a), region = 305  ;;  %s3913_s29 = smov (!%p3028_p1), 0  }
  0x7e   : > { %s3917_s16 = smov (!%p3028_p1), 0  }
  0x82 LB: >> { %v916_v33 = vld [vmem:[%s3911_s14] sm:$0xff]  ;;  %s918_s17 = sadd.s32 1, %s3915_s29  ;;  %s910_s16 = sadd.s32 1, %s3919_s16   ;;  %s3919_s16 = sphi %s3917_s16, %s910_s16   ;;  %s3915_s29 = sphi %s3913_s29, %s3914_s29   ;;  %s3911_s14 = sphi %s3909_s14, %s923_s14   ;;  %s3907_s19 = sphi %s3905_s19, %s924_s19  }
  0x83   : >> { %917 = vst [vmem:[%s3907_s19] sm:$0xff] %v916_v33  ;;  %p919_p2 = scmp.ge.s32.totalorder %s918_s17, %s4304_s15  ;;  %p909_p4 = scmp.ge.s32.totalorder %s910_s16, %s4304_s15 }
  0x85   : >> { %s5001_s17 = smov (%p919_p2, %s918_s17), 0  ;;  %912 = sbr.rel (!%p909_p4) target bundleno = 130 (0x82), region = 311 }
  0x86   : >> { %s3029_s11 = sshll.u32 %s5001_s17, 4  ;;  %s3030_s28 = sshll.u32 %s5001_s17, 3 }
  0x87   : >> { %s923_s14 = scalar_lea.vmem %s4308_s20, %s3029_s11   ;;  %s924_s19 = scalar_lea.vmem %s906_s18, %s3030_s28 [#allocation5]  }
  0x88   : >> { %s3914_s29 = smov %s5001_s17  }
  0x8a PF: > { %p3031_p5 = scmp.ge.s32.totalorder %s3855_s25, 1  ;;  %p946_p6 = scmp.lt.s32.totalorder %s3855_s25, 5 }
  0x8c   : > { %p947_p8 = pnand %p3031_p5, %p946_p6 }
  0x8d   : > { %s953_s0 = sand.u32 (!%p947_p8), 1, %s3831_s21   ;;  %s1034_s27 = sand.u32 (!%p947_p8), 1, %s3823_s30  }
  0x8e   : > { %950 = sbr.rel (%p947_p8) target bundleno = 2142 (0x85e), region = 192  ;;  %s3032_s13 = sshll.u32 (!%p947_p8), %s953_s0, 7 }
  0x8f   : > { %s3034_s3 = sshll.u32 (!%p947_p8), %s1034_s27, 4  ;;  %s4324_s26 = sshll.u32 (!%p947_p8), %s3843_s2, 1 }
  0x90   : > { %s955_s15 = scalar_lea.vmem (!%p947_p8), [#allocation4], %s3032_s13  ;;  %p1042_p9 = scmp.lt.s32.totalorder (!%p947_p8), %s4324_s26, 2 }
  0x91   : > { %s4957_s19 = sld [smem:[#allocation17_spill]] (!%p947_p8)  ;;  %s4368_s28 = scalar_lea.vmem (!%p947_p8), [#allocation5], %s3032_s13 }
  0x92   : > { %s4958_s17 = sld [smem:[#allocation20_spill]] (!%p947_p8)  ;;  %s4370_s0 = scalar_lea.vmem (!%p947_p8), [#allocation6], %s3034_s3 }
  0x93   : > { %v1080_v34 = vld [vmem:[%s955_s15] sm:$0xff]  ;;  %v4326_v35 = vld [vmem:[%s955_s15 + $0x8] sm:$0xff]  ;;  %v4328_v36 = vld [vmem:[%s955_s15 + $0x10] sm:$0xff]  ;;  %s1043_s21 = scalar_select %p1042_p9, %s4324_s26, 2 }
  0x94   : > { %v4331_v37 = vld [vmem:[%s955_s15 + $0x18] sm:$0xff]  ;;  %v4333_v38 = vld [vmem:[%s955_s15 + $0x20] sm:$0xff]  ;;  %v4335_v39 = vld [vmem:[%s955_s15 + $0x28] sm:$0xff]  ;;  %p3039_p10 = scmp.ne.s32.totalorder %s3839_s22, 0 }
  0x95   : > { %v4337_v40 = vld [vmem:[%s955_s15 + $0x30] sm:$0xff]  ;;  %v4339_v41 = vld [vmem:[%s955_s15 + $0x38] sm:$0xff]  ;;  %v4341_v42 = vld [vmem:[%s955_s15 + $0x40] sm:$0xff]  ;;  %s3036_s20 = sshll.u32 %s1043_s21, 3 }
  0x96   : > { %v4344_v43 = vld [vmem:[%s955_s15 + $0x48] sm:$0xff]  ;;  %v4346_v44 = vld [vmem:[%s955_s15 + $0x50] sm:$0xff]  ;;  %v4348_v45 = vld [vmem:[%s955_s15 + $0x58] sm:$0xff]  ;;  %1099 = sbr.rel (%p3039_p10) target bundleno = 362 (0x16a), region = 204 }
  0x97   : > { %v4350_v46 = vld [vmem:[%s955_s15 + $0x60] sm:$0xff]  ;;  %v4352_v47 = vld [vmem:[%s955_s15 + $0x68] sm:$0xff]  ;;  %v4354_v48 = vld [vmem:[%s955_s15 + $0x70] sm:$0xff]  ;;  %s4361_s14 = scalar_lea.vmem %s4957_s19, %s3036_s20 }
  0x98   : > { %v4356_v49 = vld [vmem:[%s955_s15 + $0x78] sm:$0xff]  ;;  %s4366_s11 = scalar_lea.vmem %s4958_s17, %s3036_s20 }
  0x9b   : > { %v1108_v50 = vld [vmem:[%s4900_s4 + $0x18] sm:$0xff]  ;;  %v1107_v51 = vld [vmem:[%s4900_s4 + $0x10] sm:$0xff]  ;;  %vm1100_vm0 = vcmask 261120   ;;  %v3921_v52 = vmov 0.0   ;;  %v1103_v53 = vld [vmem:[%s4361_s14] sm:$0xff] }
  0x9c   : > { %3212 = vmatprep.subr.mxu0 %v1108_v50  ;;  %1101 = vst.msk [vmem:[#allocation2] sm:$0xff] %vm1100_vm0, %v3921_v52  ;;  %1102 = vst.msk [vmem:[#allocation2 + $0x8] sm:$0xff] %vm1100_vm0, %v3921_v52  ;;  %v1106_v54 = vld [vmem:[%s4900_s4 + $0x8] sm:$0xff]  ;;  %3220 = vmatprep.mubr.msk.f32.mxu0 %vm1100_vm0, %v1103_v53  ;;  %v1105_v55 = vld [vmem:[%s4900_s4] sm:$0xff] }
  0x9d   : > { %3213 = vmatpush3.msra.mxu0 %v1108_v50  ;;  %v1104_v56 = vld [vmem:[%s4361_s14 + $0x8] sm:$0xff]  ;;  %v3040_v57 = vld [vmem:[%s4902_s6] ss:$0 sm:$0xff] }
  0x9e   : > { %3214 = vmatprep.subr.mxu0 %v1107_v51 }
  0x9f   : > { %3215 = vmatpush3.msra.mxu0 %v1107_v51 }
  0xa0   : > { %3216 = vmatprep.subr.mxu0 %v1106_v54 }
  0xa1   : > { %3217 = vmatpush3.msra.mxu0 %v1106_v54 }
  0xa2   : > { %3218 = vmatprep.subr.mxu0 %v1105_v55 }
  0xa3   : > { %3219 = vmatpush3.msra.mxu0 %v1105_v55 }
  0xa4   : > { %3221 = vmatmul.mubr.msk.f32.vlgmr.msra.gmra.mxu0 %vm1100_vm0, %v1104_v56 }
 0x164   : > { %v3222_v58 = vpop.f32.mrf.mxu0 }
 0x165   : > { %v1194_v59 = vadd.f32 %v3222_v58, %v3040_v57 }
 0x166   : > { %v1188_v60 = vpop.f32.mrf.mxu0 }
 0x167   : > { %1198 = vst.msk [vmem:[#allocation3 + $0x8] sm:$0xff] %vm1100_vm0, %v1194_v59  ;;  %v1189_v61 = vadd.f32 %v3040_v57, %v1188_v60 }
 0x169   : > { %1197 = vst.msk [vmem:[#allocation3] sm:$0xff] %vm1100_vm0, %v1189_v61 }
 0x16a PF: > { %v1206_v62 = vld [vmem:[%s4901_s5 + $0x38] sm:$0xff]  ;;  %v1205_v63 = vld [vmem:[%s4901_s5 + $0x30] sm:$0xff]  ;;  %vm1207_vm1 = vcmask 523264   ;;  %v1204_v0 = vld [vmem:[%s4901_s5 + $0x28] sm:$0xff]  ;;  %v3922_v10 = vmov 1966171168   ;;  %v1409_v12 = vlaneseq }
 0x16b   : > { %3223 = vmatprep.subr.mxu0 %v1206_v62  ;;  %3239 = vmatprep.mubr.msk.f32.mxu0 %vm1207_vm1, %v1080_v34  ;;  %v1682_v1 = vld [vmem:[%s4903_s7 + $0x18] sm:$0xff]  ;;  %v1203_v2 = vld [vmem:[%s4901_s5 + $0x20] sm:$0xff]  ;;  %v1201_v4 = vld [vmem:[%s4901_s5 + $0x10] sm:$0xff]  ;;  %v1407_v11 = vunpack.c.l.s4 %v3922_v10  ;;  %vm1690_vm2 = vcmask 261120   ;;  %vm2410_vm3 = vcmask 1041409   ;;  %vm2412_vm4 = vcmask 1042434  }
 0x16c   : > { %3224 = vmatpush3.msra.mxu0 %v1206_v62  ;;  %3373 = vmatprep.subr.mxu1 %v1682_v1  ;;  %v1202_v3 = vld [vmem:[%s4901_s5 + $0x18] sm:$0xff]  ;;  %v1200_v5 = vld [vmem:[%s4901_s5 + $0x8] sm:$0xff]  ;;  %v1199_v6 = vld [vmem:[%s4901_s5] sm:$0xff]  ;;  %v1410_v14 = vshrl.u32 %v1409_v12, 7  ;;  %vm2414_vm5 = vcmask 1043459   ;;  %vm2416_vm6 = vcmask 1044484  }
 0x16d   : > { %3225 = vmatprep.subr.mxu0 %v1205_v63  ;;  %3377 = vmatpush3.msra.mxu1 %v1682_v1  ;;  %v1681_v7 = vld [vmem:[%s4903_s7 + $0x10] sm:$0xff]  ;;  %v1680_v8 = vld [vmem:[%s4903_s7 + $0x8] sm:$0xff]  ;;  %v1679_v9 = vld [vmem:[%s4903_s7] sm:$0xff]  ;;  %v1408_v13 = vunpack.c.0.s8 %v1407_v11  ;;  %vm2418_vm7 = vcmask 1045509   ;;  %vm2420_vm8 = vcmask 1046534   ;;  %vm2422_vm9 = vcmask 1047559  }
 0x16e   : > { %3226 = vmatpush3.msra.mxu0 %v1205_v63  ;;  %3374 = vmatprep.subr.mxu1 %v1681_v7  ;;  %v4468_v22 = vsub.s32 0, %v1410_v14  ;;  %v1402_v27 = vld [vmem:[#allocation3 + $0x8] sm:$0xff]  ;;  %p3093_p3 = scmp.ne.s32.totalorder %s3839_s22, 1 }
 0x16f   : > { %3227 = vmatprep.subr.mxu0 %v1204_v0  ;;  %3378 = vmatpush3.msra.mxu1 %v1681_v7  ;;  %v4463_v15 = vsub.s32 %v1408_v13, %v1410_v14  ;;  %s4959_s15 = sld [smem:[#allocation23_spill]] (!%p3093_p3) }
 0x170   : > { %3228 = vmatpush3.msra.mxu0 %v1204_v0  ;;  %3375 = vmatprep.subr.mxu1 %v1680_v8  ;;  %v1401_v16 = vld [vmem:[#allocation3] sm:$0xff]  ;;  %s4960_s17 = sld [smem:[#allocation25_spill]] (!%p3093_p3) }
 0x171   : > { %3229 = vmatprep.subr.mxu0 %v1203_v2  ;;  %3379 = vmatpush3.msra.mxu1 %v1680_v8  ;;  %v1412_v17 = vrot.slane %v1401_v16, %v4463_v15  ;;  %v1405_v18 = vcombine.high %v1401_v16, %v1401_v16  ;;  %v1461_v32 = vrot.slane %v1402_v27, %v4463_v15  ;;  %s4961_s13 = sld [smem:[#allocation21_spill]] (!%p3093_p3) }
 0x172   : > { %3230 = vmatpush3.msra.mxu0 %v1203_v2  ;;  %3376 = vmatprep.subr.mxu1 %v1679_v9  ;;  %s4962_s19 = sld [smem:[#allocation22_spill]] (!%p3093_p3) }
 0x173   : > { %3231 = vmatprep.subr.mxu0 %v1202_v3  ;;  %3380 = vmatpush3.msra.mxu1 %v1679_v9  ;;  %v1420_v19 = vcombine.high %v1412_v17, %v1412_v17  ;;  %v1419_v20 = vrot.slane %v1405_v18, %v4463_v15  ;;  %v1428_v23 = vrot.slane %v1412_v17, %v4463_v15  ;;  %s4963_s22 = sld [smem:[#allocation24_spill]] (!%p3093_p3) }
 0x174   : > { %3232 = vmatpush3.msra.mxu0 %v1202_v3  ;;  %v1477_v0 = vrot.slane %v1461_v32, %v4463_v15  ;;  %s4964_s18 = sld [smem:[#allocation26_spill]] (!%p3093_p3) }
 0x175   : > { %3233 = vmatprep.subr.mxu0 %v1201_v4  ;;  %v1442_v21 = vrot.slane %v1420_v19, %v4463_v15  ;;  %v1421_v24 = vcombine.high %v1419_v20, %v1419_v20  ;;  %v1506_v28 = vrot.slane %v1428_v23, %v4468_v22  ;;  %v1450_v29 = vcombine.high %v1428_v23, %v1428_v23  ;;  %s4965_s20 = sld [smem:[#allocation27_spill]] (!%p3093_p3) }
 0x176   : > { %3234 = vmatpush3.msra.mxu0 %v1201_v4  ;;  %v1499_v10 = vcombine.high %v1477_v0, %v1477_v0  ;;  %s4966_s29 = sld [smem:[#allocation28_spill]] (!%p3093_p3) }
 0x177   : > { %3235 = vmatprep.subr.mxu0 %v1200_v5  ;;  %v1510_v25 = vrot.slane %v1442_v21, %v4468_v22  ;;  %v1452_v26 = vcombine.high %v1442_v21, %v1442_v21  ;;  %v1449_v31 = vrot.slane %v1421_v24, %v4463_v15 }
 0x178   : > { %3236 = vmatpush3.msra.mxu0 %v1200_v5 }
 0x179   : > { %3237 = vmatprep.subr.mxu0 %v1199_v6  ;;  %v1518_v34 = vrot.slane %v1452_v26, %v4468_v22  ;;  %v1546_v26 = vrot.slane %v1499_v10, %v4468_v22 }
 0x17a   : > { %3238 = vmatpush3.msra.mxu0 %v1199_v6 }
 0x17b   : > { %3240 = vmatmul.mubr.msk.f32.vlgmr.msra.gmra.mxu0 %vm1207_vm1, %v4326_v35  ;;  %3263 = vmatprep.subr.mxu0 %v1682_v1 }
 0x17c   : > { %3242 = vmatprep.mubr.msk.f32.mxu0 %vm1207_vm1, %v4328_v36  ;;  %3264 = vmatpush3.msra.mxu0 %v1682_v1  ;;  %v1435_v36 = vrot.slane %v1419_v20, %v4463_v15 }
 0x17d   : > { %3265 = vmatprep.subr.mxu0 %v1681_v7 }
 0x17e   : > { %3266 = vmatpush3.msra.mxu0 %v1681_v7  ;;  %v1451_v51 = vcombine.high %v1435_v36, %v1435_v36 }
 0x17f   : > { %3243 = vmatmul.mubr.msk.f32.gmra.mxu0 %vm1207_vm1, %v4331_v37  ;;  %3267 = vmatprep.subr.mxu0 %v1680_v8 }
 0x180   : > { %3245 = vmatprep.mubr.msk.f32.mxu0 %vm1207_vm1, %v4333_v38  ;;  %3268 = vmatpush3.msra.mxu0 %v1680_v8  ;;  %v1530_v61 = vrot.slane %v1451_v51, %v4468_v22 }
 0x181   : > { %3269 = vmatprep.subr.mxu0 %v1679_v9 }
 0x182   : > { %3270 = vmatpush3.msra.mxu0 %v1679_v9  ;;  %v1538_v9 = vrot.slane %v1477_v0, %v4468_v22 }
 0x183   : > { %3246 = vmatmul.mubr.msk.f32.gmra.mxu0 %vm1207_vm1, %v4335_v39  ;;  %v1514_v39 = vrot.slane %v1450_v29, %v4468_v22 }
 0x184   : > { %3248 = vmatprep.mubr.msk.f32.mxu0 %vm1207_vm1, %v4337_v40 }
 0x187   : > { %3249 = vmatmul.mubr.msk.f32.gmra.mxu0 %vm1207_vm1, %v4339_v41  ;;  %v1526_v41 = vrot.slane %v1449_v31, %v4468_v22 }
 0x188   : > { %3251 = vmatprep.mubr.msk.f32.mxu0 %vm1207_vm1, %v4341_v42  ;;  %v1469_v42 = vcombine.high %v1461_v32, %v1461_v32 }
 0x18a   : > { %v1491_v53 = vrot.slane %v1469_v42, %v4463_v15 }
 0x18b   : > { %3252 = vmatmul.mubr.msk.f32.gmra.mxu0 %vm1207_vm1, %v4344_v43  ;;  %v1454_v43 = vcombine.high %v1402_v27, %v1402_v27 }
 0x18c   : > { %3254 = vmatprep.mubr.msk.f32.mxu0 %vm1207_vm1, %v4346_v44  ;;  %v1542_v63 = vrot.slane %v1491_v53, %v4468_v22  ;;  %v1501_v4 = vcombine.high %v1491_v53, %v1491_v53 }
 0x18d   : > { %v1468_v54 = vrot.slane %v1454_v43, %v4463_v15 }
 0x18e   : > { %v1550_v14 = vrot.slane %v1501_v4, %v4468_v22 }
 0x18f   : > { %3255 = vmatmul.mubr.msk.f32.gmra.mxu0 %vm1207_vm1, %v4348_v45  ;;  %v1470_v1 = vcombine.high %v1468_v54, %v1468_v54  ;;  %v1484_v18 = vrot.slane %v1468_v54, %v4463_v15 }
 0x190   : > { %3257 = vmatprep.mubr.msk.f32.mxu0 %vm1207_vm1, %v4350_v46  ;;  %v1453_v46 = vcombine.high %v1449_v31, %v1449_v31 }
 0x191   : > { %v1498_v11 = vrot.slane %v1470_v1, %v4463_v15 }
 0x192   : > { %v1534_v57 = vrot.slane %v1453_v46, %v4468_v22 }
 0x193   : > { %3258 = vmatmul.mubr.msk.f32.gmra.mxu0 %vm1207_vm1, %v4352_v47  ;;  %v1502_v20 = vcombine.high %v1498_v11, %v1498_v11  ;;  %v1558_v27 = vrot.slane %v1498_v11, %v4468_v22 }
 0x194   : > { %3260 = vmatprep.mubr.msk.f32.mxu0 %vm1207_vm1, %v4354_v48  ;;  %v1522_v48 = vrot.slane %v1435_v36, %v4468_v22 }
 0x197   : > { %3261 = vmatmul.mubr.msk.f32.gmra.mxu0 %vm1207_vm1, %v4356_v49 }
 0x23b   : > { %v3241_v30 = vpop.f32.mrf.mxu0 }
 0x23c   : > { %v4475_v33 = vadd.f32 %v3241_v30, %v1510_v25 }
 0x23d   : > { %v1322_v35 = vpop.f32.mrf.mxu0 }
 0x23e   : > { %v1616_v37 = vmul.f32 0.70710677, %v4475_v33  ;;  %v1583_v38 = vadd.f32 %v1506_v28, %v1322_v35  ;;  %v1600_v15 = vmul.f32 0.5, %v4475_v33  ;;  %v1554_v35 = vrot.slane %v1484_v18, %v4468_v22 }
 0x23f   : > { %v3244_v40 = vpop.f32.mrf.mxu0 }
 0x240   : > { %3605 = verf.f32 %v1616_v37  ;;  %v1615_v44 = vmul.f32 0.70710677, %v1583_v38  ;;  %v4482_v45 = vadd.f32 %v3244_v40, %v1518_v34  ;;  %v1599_v28 = vmul.f32 0.5, %v1583_v38 }
 0x241   : > { %v1332_v47 = vpop.f32.mrf.mxu0  ;;  %v1500_v40 = vcombine.high %v1484_v18, %v1484_v18 }
 0x242   : > { %3607 = verf.f32 %v1615_v44  ;;  %v1618_v49 = vmul.f32 0.70710677, %v4482_v45  ;;  %v4486_v50 = vadd.f32 %v1514_v39, %v1332_v47  ;;  %v1566_v39 = vrot.slane %v1502_v20, %v4468_v22 }
 0x243   : > { %v3247_v52 = vpop.f32.mrf.mxu0 }
 0x244   : > { %3609 = verf.f32 %v1618_v49  ;;  %v1617_v55 = vmul.f32 0.70710677, %v4486_v50  ;;  %v4491_v56 = vadd.f32 %v3247_v52, %v1526_v41  ;;  %v1601_v33 = vmul.f32 0.5, %v4486_v50 }
 0x245   : > { %v1342_v58 = vpop.f32.mrf.mxu0  ;;  %v1602_v49 = vmul.f32 0.5, %v4482_v45 }
 0x246   : > { %3611 = verf.f32 %v1617_v55  ;;  %v1620_v59 = vmul.f32 0.70710677, %v4491_v56  ;;  %v4495_v60 = vadd.f32 %v1522_v48, %v1342_v58  ;;  %v1562_v55 = vrot.slane %v1500_v40, %v4468_v22 }
 0x247   : > { %v3250_v62 = vpop.f32.mrf.mxu0  ;;  %v1604_v1 = vmul.f32 0.5, %v4491_v56 }
 0x248   : > { %3613 = verf.f32 %v1620_v59  ;;  %v1619_v2 = vmul.f32 0.70710677, %v4495_v60  ;;  %v4501_v3 = vadd.f32 %v3250_v62, %v1534_v57  ;;  %v1603_v62 = vmul.f32 0.5, %v4495_v60 }
 0x249   : > { %v1352_v5 = vpop.f32.mrf.mxu0 }
 0x24a   : > { %3615 = verf.f32 %v1619_v2  ;;  %v1622_v6 = vmul.f32 0.70710677, %v4501_v3  ;;  %v4504_v7 = vadd.f32 %v1530_v61, %v1352_v5  ;;  %v1606_v56 = vmul.f32 0.5, %v4501_v3 }
 0x24b   : > { %v3253_v8 = vpop.f32.mrf.mxu0 }
 0x24c   : > { %3617 = verf.f32 %v1622_v6  ;;  %v1621_v12 = vmul.f32 0.70710677, %v4504_v7  ;;  %v4509_v13 = vadd.f32 %v3253_v8, %v1542_v63  ;;  %v1605_v60 = vmul.f32 0.5, %v4504_v7 }
 0x24d   : > { %v3606_v16 = vpop.eup %3605  ;;  %v1362_v17 = vpop.f32.mrf.mxu0 }
 0x24e   : > { %3619 = verf.f32 %v1621_v12  ;;  %v1624_v19 = vmul.f32 0.70710677, %v4509_v13  ;;  %v1648_v23 = vadd.f32 1.0, %v3606_v16  ;;  %v4514_v24 = vadd.f32 %v1538_v9, %v1362_v17 }
 0x24f   : > { %v3608_v21 = vpop.eup %3607  ;;  %v3256_v25 = vpop.f32.mrf.mxu0 }
 0x250   : > { %v1647_v29 = vadd.f32 1.0, %v3608_v21  ;;  %3621 = verf.f32 %v1624_v19  ;;  %v4518_v30 = vadd.f32 %v3256_v25, %v1550_v14  ;;  %v1623_v32 = vmul.f32 0.70710677, %v4514_v24 }
 0x251   : > { %v3610_v31 = vpop.eup %3609  ;;  %v1372_v34 = vpop.f32.mrf.mxu0  ;;  %v1664_v41 = vmul.f32 %v1648_v23, %v1600_v15  ;;  %v1607_v7 = vmul.f32 0.5, %v4514_v24  ;;  %v1608_v23 = vmul.f32 0.5, %v4509_v13 }
 0x252   : > { %v1663_v36 = vmul.f32 %v1647_v29, %v1599_v28  ;;  %v1626_v37 = vmul.f32 0.70710677, %v4518_v30  ;;  %v1650_v42 = vadd.f32 1.0, %v3610_v31  ;;  %3623 = verf.f32 %v1623_v32 }
 0x253   : > { %v3612_v38 = vpop.eup %3611  ;;  %v1593_v43 = vadd.f32 %v1546_v26, %v1372_v34  ;;  %v3259_v44 = vpop.f32.mrf.mxu0  ;;  %v1610_v15 = vmul.f32 0.5, %v4518_v30 }
 0x254   : > { %v1649_v46 = vadd.f32 1.0, %v3612_v38  ;;  %3625 = verf.f32 %v1626_v37  ;;  %v4526_v47 = vadd.f32 %v3259_v44, %v1558_v27  ;;  %3271 = vmatprep.mubr.msk.f32.mxu0 %vm1690_vm2, %v1663_v36  ;;  %v1666_v50 = vmul.f32 %v1650_v42, %v1602_v49  ;;  %v1965_v49 = vld [vmem:[%s4905_s9 + $0x8] sm:$0xff] }
 0x255   : > { %v3614_v48 = vpop.eup %3613  ;;  %v1625_v51 = vmul.f32 0.70710677, %v1593_v43  ;;  %v1382_v52 = vpop.f32.mrf.mxu0  ;;  %3272 = vmatmul.mubr.msk.f32.vlgmr.msra.gmra.mxu0 %vm1690_vm2, %v1664_v41  ;;  %v1609_v29 = vmul.f32 0.5, %v1593_v43 }
 0x256   : > { %v1665_v53 = vmul.f32 %v1649_v46, %v1601_v33  ;;  %v1628_v54 = vmul.f32 0.70710677, %v4526_v47  ;;  %v1652_v58 = vadd.f32 1.0, %v3614_v48  ;;  %v1595_v59 = vadd.f32 %v1554_v35, %v1382_v52  ;;  %v1966_v48 = vld [vmem:[%s4905_s9 + $0x10] sm:$0xff]  ;;  %v2176_v52 = vld [vmem:[%s4368_s28 + $0x40] sm:$0xff] }
 0x257   : > { %v3616_v57 = vpop.eup %3615  ;;  %3627 = verf.f32 %v1625_v51  ;;  %v3262_v61 = vpop.f32.mrf.mxu0  ;;  %v1964_v51 = vld [vmem:[%s4905_s9] sm:$0xff] }
 0x258   : > { %v1651_v63 = vadd.f32 1.0, %v3616_v57  ;;  %3629 = verf.f32 %v1628_v54  ;;  %v1598_v45 = vadd.f32 %v3262_v61, %v1566_v39  ;;  %3274 = vmatprep.mubr.msk.f32.mxu0 %vm1690_vm2, %v1665_v53  ;;  %v1627_v2 = vmul.f32 0.70710677, %v1595_v59  ;;  %v2168_v53 = vld [vmem:[%s4368_s28] sm:$0xff]  ;;  %v2169_v57 = vld [vmem:[%s4368_s28 + $0x8] sm:$0xff]  ;;  %v2171_v61 = vld [vmem:[%s4368_s28 + $0x18] sm:$0xff] }
 0x259   : > { %v3618_v0 = vpop.eup %3617  ;;  %v1392_v4 = vpop.f32.mrf.mxu0  ;;  %3275 = vmatmul.mubr.msk.f32.gmra.mxu0 %vm1690_vm2, %v1666_v50  ;;  %v1668_v8 = vmul.f32 %v1652_v58, %v1604_v1  ;;  %v1611_v37 = vmul.f32 0.5, %v1595_v59  ;;  %v1612_v39 = vmul.f32 0.5, %v4526_v47  ;;  %v1967_v47 = vld [vmem:[%s4905_s9 + $0x18] sm:$0xff]  ;;  %v3923_v54 = vmov 0   ;;  %v2178_v50 = vld [vmem:[%s4368_s28 + $0x50] sm:$0xff] }
 0x25a   : > { %v1667_v22 = vmul.f32 %v1651_v63, %v1603_v62  ;;  %v1630_v5 = vmul.f32 0.70710677, %v1598_v45  ;;  %v1654_v9 = vadd.f32 1.0, %v3618_v0  ;;  %3631 = verf.f32 %v1627_v2  ;;  %3295 = vmatprep.subr.mxu1 %v1967_v47  ;;  %3602 = vset.pattern.permute.xlu1 %v3923_v54  ;;  %v2170_v58 = vld [vmem:[%s4368_s28 + $0x10] sm:$0xff]  ;;  %v2179_v59 = vld [vmem:[%s4368_s28 + $0x58] sm:$0xff]  ;;  %v2180_v62 = vld [vmem:[%s4368_s28 + $0x60] sm:$0xff] }
 0x25b   : > { %v3620_v6 = vpop.eup %3619  ;;  %v1597_v10 = vadd.f32 %v1562_v55, %v1392_v4  ;;  %v1614_v44 = vmul.f32 0.5, %v1598_v45  ;;  %3601 = vset.pattern.permute.xlu0 %v3923_v54  ;;  %2226 = vperm.xlu1 %3602, %v2176_v52   ;;  %v2177_v55 = vld [vmem:[%s4368_s28 + $0x48] sm:$0xff]  ;;  %v2172_v63 = vld [vmem:[%s4368_s28 + $0x20] sm:$0xff]  ;;  %v2182_v1 = vld [vmem:[%s4368_s28 + $0x70] sm:$0xff] }
 0x25c   : > { %3633 = verf.f32 %v1630_v5  ;;  %3277 = vmatprep.mubr.msk.f32.mxu0 %vm1690_vm2, %v1667_v22  ;;  %v1653_v11 = vadd.f32 1.0, %v3620_v6  ;;  %v1670_v17 = vmul.f32 %v1654_v9, %v1606_v56  ;;  %2186 = vperm.xlu0 %3601, %v2168_v53   ;;  %v2181_v45 = vld [vmem:[%s4368_s28 + $0x68] sm:$0xff]  ;;  %v2174_v2 = vld [vmem:[%s4368_s28 + $0x30] sm:$0xff]  ;;  %v2183_v4 = vld [vmem:[%s4368_s28 + $0x78] sm:$0xff] }
 0x25d   : > { %v3622_v12 = vpop.eup %3621  ;;  %v1629_v14 = vmul.f32 0.70710677, %v1597_v10  ;;  %3278 = vmatmul.mubr.msk.f32.gmra.mxu0 %vm1690_vm2, %v1668_v8  ;;  %v1613_v30 = vmul.f32 0.5, %v1597_v10  ;;  %v2173_v0 = vld [vmem:[%s4368_s28 + $0x28] sm:$0xff]  ;;  %v2175_v22 = vld [vmem:[%s4368_s28 + $0x38] sm:$0xff] }
 0x25e   : > { %v1669_v16 = vmul.f32 %v1653_v11, %v1605_v60  ;;  %v1656_v19 = vadd.f32 1.0, %v3622_v12  ;;  %v4586_v5 = vld [vmem:[%s4904_s8] ss:$0 sm:$0xff] }
 0x25f   : > { %3635 = verf.f32 %v1629_v14  ;;  %v3624_v18 = vpop.eup %3623  ;;  %2231 = vperm.xlu1 %3602, %v2177_v55  }
 0x260   : > { %3280 = vmatprep.mubr.msk.f32.mxu1 %vm1690_vm2, %v1669_v16  ;;  %v1655_v21 = vadd.f32 1.0, %v3624_v18  ;;  %v1672_v26 = vmul.f32 %v1656_v19, %v1608_v23  ;;  %2191 = vperm.xlu0 %3601, %v2169_v57  }
 0x261   : > { %v3626_v20 = vpop.eup %3625  ;;  %3281 = vmatmul.mubr.msk.f32.vlgmr.msra.gmra.mxu1 %vm1690_vm2, %v1670_v17 }
 0x262   : > { %v1671_v25 = vmul.f32 %v1655_v21, %v1607_v7  ;;  %v1658_v27 = vadd.f32 1.0, %v3626_v20  ;;  %3296 = vmatpush3.msra.mxu1 %v1967_v47 }
 0x263   : > { %3297 = vmatprep.subr.mxu1 %v1966_v48  ;;  %2236 = vperm.xlu1 %3602, %v2178_v50  }
 0x264   : > { %v3628_v3 = vpop.eup %3627  ;;  %3283 = vmatprep.mubr.msk.f32.mxu1 %vm1690_vm2, %v1671_v25  ;;  %v1674_v34 = vmul.f32 %v1658_v27, %v1610_v15  ;;  %3298 = vmatpush3.msra.mxu1 %v1966_v48 }
 0x265   : > { %v3630_v28 = vpop.eup %3629  ;;  %v1657_v31 = vadd.f32 1.0, %v3628_v3  ;;  %3284 = vmatmul.mubr.msk.f32.gmra.mxu1 %vm1690_vm2, %v1672_v26  ;;  %3299 = vmatprep.subr.mxu1 %v1965_v49 }
 0x266   : > { %v1660_v35 = vadd.f32 1.0, %v3630_v28  ;;  %3300 = vmatpush3.msra.mxu1 %v1965_v49  ;;  %2196 = vperm.xlu0 %3601, %v2170_v58  }
 0x267   : > { %v1673_v32 = vmul.f32 %v1657_v31, %v1609_v29  ;;  %v3632_v24 = vpop.eup %3631  ;;  %3301 = vmatprep.subr.mxu1 %v1964_v51  ;;  %2241 = vperm.xlu1 %3602, %v2179_v59  }
 0x268   : > { %v1659_v13 = vadd.f32 1.0, %v3632_v24  ;;  %v1676_v41 = vmul.f32 %v1660_v35, %v1612_v39  ;;  %3302 = vmatpush3.msra.mxu1 %v1964_v51 }
 0x269   : > { %v3634_v36 = vpop.eup %3633  ;;  %3286 = vmatprep.mubr.msk.f32.mxu1 %vm1690_vm2, %v1673_v32 }
 0x26a   : > { %3287 = vmatmul.mubr.msk.f32.gmra.mxu1 %vm1690_vm2, %v1674_v34  ;;  %v1675_v40 = vmul.f32 %v1659_v13, %v1611_v37  ;;  %v1662_v42 = vadd.f32 1.0, %v3634_v36  ;;  %2201 = vperm.xlu0 %3601, %v2171_v61  }
 0x26b   : > { %2246 = vperm.xlu1 %3602, %v2180_v62  }
 0x26c   : > { %v3636_v38 = vpop.eup %3635  ;;  %3289 = vmatprep.mubr.msk.f32.mxu1 %vm1690_vm2, %v1675_v40  ;;  %v1678_v46 = vmul.f32 %v1662_v42, %v1614_v44 }
 0x26d   : > { %v1661_v43 = vadd.f32 1.0, %v3636_v38 }
 0x26e   : > { %3290 = vmatmul.mubr.msk.f32.gmra.mxu1 %vm1690_vm2, %v1676_v41  ;;  %2206 = vperm.xlu0 %3601, %v2172_v63  }
 0x26f   : > { %v1677_v33 = vmul.f32 %v1661_v43, %v1613_v30  ;;  %2251 = vperm.xlu1 %3602, %v2181_v45  }
 0x271   : > { %3292 = vmatprep.mubr.msk.f32.mxu1 %vm1690_vm2, %v1677_v33 }
 0x272   : > { %3293 = vmatmul.mubr.msk.f32.gmra.mxu1 %vm1690_vm2, %v1678_v46  ;;  %2211 = vperm.xlu0 %3601, %v2173_v0  }
 0x273   : > { %2256 = vperm.xlu1 %3602, %v2182_v1  }
 0x276   : > { %2216 = vperm.xlu0 %3601, %v2174_v2  }
 0x277   : > { %2261 = vperm.xlu1 %3602, %v2183_v4  }
 0x27a   : > { %2221 = vperm.xlu0 %3601, %v2175_v22  }
 0x315   : > { %v3273_v6 = vpop.f32.mrf.mxu0 }
 0x316   : > { %v1811_v8 = vadd.f32 %v3273_v6, %v4586_v5 }
 0x317   : > { %v1805_v9 = vpop.f32.mrf.mxu0 }
 0x318   : > { %v1901_v10 = vmul.f32 0.70710677, %v1811_v8  ;;  %v1806_v60 = vadd.f32 %v4586_v5, %v1805_v9  ;;  %v1885_v39 = vmul.f32 0.5, %v1811_v8 }
 0x319   : > { %v3276_v11 = vpop.f32.mrf.mxu0 }
 0x31a   : > { %3637 = verf.f32 %v1901_v10  ;;  %v1900_v12 = vmul.f32 0.70710677, %v1806_v60  ;;  %v1821_v56 = vadd.f32 %v3276_v11, %v4586_v5  ;;  %v1884_v40 = vmul.f32 0.5, %v1806_v60 }
 0x31b   : > { %v1815_v14 = vpop.f32.mrf.mxu0 }
 0x31c   : > { %3639 = verf.f32 %v1900_v12  ;;  %v1903_v16 = vmul.f32 0.70710677, %v1821_v56  ;;  %v1816_v17 = vadd.f32 %v4586_v5, %v1815_v14  ;;  %v1887_v57 = vmul.f32 0.5, %v1821_v56 }
 0x31d   : > { %v3279_v18 = vpop.f32.mrf.mxu0 }
 0x31e   : > { %3641 = verf.f32 %v1903_v16  ;;  %v1902_v19 = vmul.f32 0.70710677, %v1816_v17  ;;  %v1831_v20 = vadd.f32 %v3279_v18, %v4586_v5  ;;  %v1886_v52 = vmul.f32 0.5, %v1816_v17 }
 0x31f   : > { %v1825_v7 = vpop.f32.mrf.mxu0 }
 0x320   : > { %3643 = verf.f32 %v1902_v19  ;;  %v1905_v21 = vmul.f32 0.70710677, %v1831_v20  ;;  %v1826_v23 = vadd.f32 %v4586_v5, %v1825_v7  ;;  %v1889_v2 = vmul.f32 0.5, %v1831_v20 }
 0x321   : > { %v3282_v25 = vpop.f32.mrf.mxu1 }
 0x322   : > { %3645 = verf.f32 %v1905_v21  ;;  %v1904_v3 = vmul.f32 0.70710677, %v1826_v23  ;;  %v4595_v26 = vadd.f32 %v3282_v25, %v4586_v5  ;;  %v1888_v4 = vmul.f32 0.5, %v1826_v23 }
 0x323   : > { %v1835_v27 = vpop.f32.mrf.mxu1 }
 0x324   : > { %3647 = verf.f32 %v1904_v3  ;;  %v1907_v28 = vmul.f32 0.70710677, %v4595_v26  ;;  %v4599_v29 = vadd.f32 %v4586_v5, %v1835_v27  ;;  %v1891_v20 = vmul.f32 0.5, %v4595_v26 }
 0x325   : > { %v3285_v15 = vpop.f32.mrf.mxu1 }
 0x326   : > { %3649 = verf.f32 %v1907_v28  ;;  %v1906_v31 = vmul.f32 0.70710677, %v4599_v29  ;;  %v4603_v24 = vadd.f32 %v3285_v15, %v4586_v5  ;;  %v1890_v18 = vmul.f32 0.5, %v4599_v29 }
 0x327   : > { %v3638_v32 = vpop.eup %3637  ;;  %v1845_v35 = vpop.f32.mrf.mxu1 }
 0x328   : > { %v1933_v34 = vadd.f32 1.0, %v3638_v32  ;;  %3651 = verf.f32 %v1906_v31  ;;  %v1909_v37 = vmul.f32 0.70710677, %v4603_v24  ;;  %v4607_v13 = vadd.f32 %v4586_v5, %v1845_v35 }
 0x329   : > { %v3640_v36 = vpop.eup %3639  ;;  %v1893_v26 = vmul.f32 0.5, %v4603_v24 }
 0x32a   : > { %v1932_v38 = vadd.f32 1.0, %v3640_v36  ;;  %v3288_v41 = vpop.f32.mrf.mxu1  ;;  %3653 = verf.f32 %v1909_v37  ;;  %v1908_v30 = vmul.f32 0.70710677, %v4607_v13  ;;  %v1949_v44 = vmul.f32 %v1933_v34, %v1885_v39 }
 0x32b   : > { %v3642_v42 = vpop.eup %3641  ;;  %v4611_v43 = vadd.f32 %v3288_v41, %v4586_v5 }
 0x32c   : > { %v1948_v33 = vmul.f32 %v1932_v38, %v1884_v40  ;;  %v1855_v46 = vpop.f32.mrf.mxu1  ;;  %v1935_v48 = vadd.f32 1.0, %v3642_v42  ;;  %3655 = verf.f32 %v1908_v30 }
 0x32d   : > { %v3644_v47 = vpop.eup %3643  ;;  %v1911_v49 = vmul.f32 0.70710677, %v4611_v43  ;;  %v1856_v51 = vadd.f32 %v4586_v5, %v1855_v46  ;;  %v1895_v39 = vmul.f32 0.5, %v4611_v43 }
 0x32e   : > { %v1934_v53 = vadd.f32 1.0, %v3644_v47  ;;  %v3291_v54 = vpop.f32.mrf.mxu1  ;;  %3303 = vmatprep.mubr.msk.f32.mxu1 %vm1690_vm2, %v1948_v33  ;;  %v1951_v45 = vmul.f32 %v1935_v48, %v1887_v57 }
 0x32f   : > { %v3646_v55 = vpop.eup %3645  ;;  %3657 = verf.f32 %v1911_v49  ;;  %v1910_v50 = vmul.f32 0.70710677, %v1856_v51  ;;  %v4617_v58 = vadd.f32 %v3291_v54, %v4586_v5  ;;  %3304 = vmatmul.mubr.msk.f32.vlgmr.msra.gmra.mxu1 %vm1690_vm2, %v1949_v44  ;;  %v1894_v35 = vmul.f32 0.5, %v1856_v51  ;;  %v2187_v54 = vpop.permute.xlu0 %2186 }
 0x330   : > { %v1950_v59 = vmul.f32 %v1934_v53, %v1886_v52  ;;  %v1937_v61 = vadd.f32 1.0, %v3646_v55  ;;  %v1865_v62 = vpop.f32.mrf.mxu1 }
 0x331   : > { %v3648_v63 = vpop.eup %3647  ;;  %3659 = verf.f32 %v1910_v50  ;;  %v1913_v0 = vmul.f32 0.70710677, %v4617_v58  ;;  %v1866_v1 = vadd.f32 %v4586_v5, %v1865_v62  ;;  %v1897_v44 = vmul.f32 0.5, %v4617_v58  ;;  %v4644_v58 = vpop.permute.xlu1 %2226 }
 0x332   : > { %v1936_v22 = vadd.f32 1.0, %v3648_v63  ;;  %v3294_v6 = vpop.f32.mrf.mxu1  ;;  %3306 = vmatprep.mubr.msk.f32.mxu1 %vm1690_vm2, %v1950_v59  ;;  %v1953_v60 = vmul.f32 %v1937_v61, %v1889_v2  ;;  %v4649_v61 = vld [vmem:[%s4906_s10] ss:$0 sm:$0xff] }
 0x333   : > { %v3650_v8 = vpop.eup %3649  ;;  %3661 = verf.f32 %v1913_v0  ;;  %v1912_v9 = vmul.f32 0.70710677, %v1866_v1  ;;  %v1881_v10 = vadd.f32 %v3294_v6, %v4586_v5  ;;  %3307 = vmatmul.mubr.msk.f32.gmra.mxu1 %vm1690_vm2, %v1951_v45  ;;  %v1896_v42 = vmul.f32 0.5, %v1866_v1  ;;  %v2192_v55 = vpop.permute.xlu0 %2191 }
 0x334   : > { %v1952_v11 = vmul.f32 %v1936_v22, %v1888_v4  ;;  %v1875_v12 = vpop.f32.mrf.mxu1  ;;  %v1939_v14 = vadd.f32 1.0, %v3650_v8 }
 0x335   : > { %v3652_v56 = vpop.eup %3651  ;;  %3663 = verf.f32 %v1912_v9  ;;  %v1915_v16 = vmul.f32 0.70710677, %v1881_v10  ;;  %v1876_v17 = vadd.f32 %v4586_v5, %v1875_v12  ;;  %v1892_v5 = vmul.f32 0.5, %v4607_v13  ;;  %v4651_v62 = vpop.permute.xlu1 %2231 }
 0x336   : > { %v1938_v19 = vadd.f32 1.0, %v3652_v56  ;;  %3309 = vmatprep.mubr.msk.f32.mxu1 %vm1690_vm2, %v1952_v11  ;;  %v1955_v25 = vmul.f32 %v1939_v14, %v1891_v20  ;;  %v1899_v51 = vmul.f32 0.5, %v1881_v10 }
 0x337   : > { %3665 = verf.f32 %v1915_v16  ;;  %v1914_v7 = vmul.f32 0.70710677, %v1876_v17  ;;  %3310 = vmatmul.mubr.msk.f32.gmra.mxu1 %vm1690_vm2, %v1953_v60  ;;  %v3654_v21 = vpop.eup %3653  ;;  %v1898_v43 = vmul.f32 0.5, %v1876_v17  ;;  %v2197_v57 = vpop.permute.xlu0 %2196 }
 0x338   : > { %v1954_v23 = vmul.f32 %v1938_v19, %v1890_v18  ;;  %v1941_v27 = vadd.f32 1.0, %v3654_v21 }
 0x339   : > { %3667 = verf.f32 %v1914_v7  ;;  %v3656_v3 = vpop.eup %3655  ;;  %v4655_v6 = vpop.permute.xlu1 %2236 }
 0x33a   : > { %3312 = vmatprep.mubr.msk.f32.mxu1 %vm1690_vm2, %v1954_v23  ;;  %v1940_v28 = vadd.f32 1.0, %v3656_v3  ;;  %v1957_v32 = vmul.f32 %v1941_v27, %v1893_v26 }
 0x33b   : > { %3313 = vmatmul.mubr.msk.f32.gmra.mxu1 %vm1690_vm2, %v1955_v25  ;;  %v2202_v50 = vpop.permute.xlu0 %2201 }
 0x33c   : > { %v3658_v29 = vpop.eup %3657  ;;  %v1956_v31 = vmul.f32 %v1940_v28, %v1892_v5 }
 0x33d   : > { %v1943_v34 = vadd.f32 1.0, %v3658_v29  ;;  %v4663_v5 = vpop.permute.xlu1 %2241 }
 0x33e   : > { %v3660_v15 = vpop.eup %3659  ;;  %3315 = vmatprep.mubr.msk.f32.mxu1 %vm1690_vm2, %v1956_v31 }
 0x33f   : > { %v1942_v36 = vadd.f32 1.0, %v3660_v15  ;;  %3316 = vmatmul.mubr.msk.f32.gmra.mxu1 %vm1690_vm2, %v1957_v32  ;;  %v1959_v38 = vmul.f32 %v1943_v34, %v1895_v39  ;;  %v2207_v59 = vpop.permute.xlu0 %2206 }
 0x340   : > { %v3662_v37 = vpop.eup %3661 }
 0x341   : > { %v1958_v13 = vmul.f32 %v1942_v36, %v1894_v35  ;;  %v1945_v41 = vadd.f32 1.0, %v3662_v37 }
 0x342   : > { %v3664_v40 = vpop.eup %3663 }
 0x343   : > { %v1944_v30 = vadd.f32 1.0, %v3664_v40  ;;  %3318 = vmatprep.mubr.msk.f32.mxu1 %vm1690_vm2, %v1958_v13  ;;  %v1961_v47 = vmul.f32 %v1945_v41, %v1897_v44  ;;  %v2212_v0 = vpop.permute.xlu0 %2211 }
 0x344   : > { %v3666_v24 = vpop.eup %3665  ;;  %3319 = vmatmul.mubr.msk.f32.gmra.mxu1 %vm1690_vm2, %v1959_v38 }
 0x345   : > { %v1960_v33 = vmul.f32 %v1944_v30, %v1896_v42  ;;  %v1947_v48 = vadd.f32 1.0, %v3666_v24 }
 0x346   : > { %v3668_v46 = vpop.eup %3667 }
 0x347   : > { %v1946_v49 = vadd.f32 1.0, %v3668_v46  ;;  %3321 = vmatprep.mubr.msk.f32.mxu1 %vm1690_vm2, %v1960_v33  ;;  %v1963_v53 = vmul.f32 %v1947_v48, %v1899_v51  ;;  %v2217_v17 = vpop.permute.xlu0 %2216 }
 0x348   : > { %3322 = vmatmul.mubr.msk.f32.gmra.mxu1 %vm1690_vm2, %v1961_v47 }
 0x349   : > { %v1962_v52 = vmul.f32 %v1946_v49, %v1898_v43  ;;  %v4671_v49 = vpop.permute.xlu1 %2246 }
 0x34b   : > { %3324 = vmatprep.mubr.msk.f32.mxu1 %vm1690_vm2, %v1962_v52  ;;  %v2222_v38 = vpop.permute.xlu0 %2221 }
 0x34c   : > { %3325 = vmatmul.mubr.msk.f32.gmra.mxu1 %vm1690_vm2, %v1963_v53 }
 0x3ef   : > { %v3305_v63 = vpop.f32.mrf.mxu1 }
 0x3f0   : > { %v2095_v45 = vadd.f32 %v3305_v63, %v4649_v61 }
 0x3f1   : > { %v2089_v1 = vpop.f32.mrf.mxu1 }
 0x3f2   : > { %v2265_v2 = vmul.f32 %v2192_v55, %v2095_v45  ;;  %v2090_v4 = vadd.f32 %v4649_v61, %v2089_v1 }
 0x3f3   : > { %v3308_v22 = vpop.f32.mrf.mxu1 }
 0x3f4   : > { %v2289_v8 = vsel %vm1690_vm2, %v2265_v2, 0.0  ;;  %v2264_v9 = vmul.f32 %v2187_v54, %v2090_v4  ;;  %v2105_v10 = vadd.f32 %v3308_v22, %v4649_v61 }
 0x3f5   : > { %v2290_v60 = vrot.slane %v2289_v8, 4  ;;  %v2099_v11 = vpop.f32.mrf.mxu1 }
 0x3f6   : > { %v2282_v12 = vsel %vm1690_vm2, %v2264_v9, 0.0  ;;  %v2267_v56 = vmul.f32 %v2202_v50, %v2105_v10  ;;  %v2100_v14 = vadd.f32 %v4649_v61, %v2099_v11 }
 0x3f7   : > { %v2291_v16 = vadd.f32 %v2290_v60, %v2289_v8  ;;  %v2283_v18 = vrot.slane %v2282_v12, 4  ;;  %v3311_v19 = vpop.f32.mrf.mxu1 }
 0x3f8   : > { %v2303_v20 = vsel %vm1690_vm2, %v2267_v56, 0.0  ;;  %v2266_v7 = vmul.f32 %v2197_v57, %v2100_v14  ;;  %v2115_v21 = vadd.f32 %v3311_v19, %v4649_v61  ;;  %v2252_v19 = vpop.permute.xlu1 %2251 }
 0x3f9   : > { %v2292_v23 = vrot.slane %v2291_v16, 2  ;;  %v2284_v25 = vadd.f32 %v2283_v18, %v2282_v12  ;;  %v2304_v3 = vrot.slane %v2303_v20, 4  ;;  %v2109_v27 = vpop.f32.mrf.mxu1 }
 0x3fa   : > { %v2296_v28 = vsel %vm1690_vm2, %v2266_v7, 0.0  ;;  %v2269_v29 = vmul.f32 %v2212_v0, %v2115_v21  ;;  %v2110_v26 = vadd.f32 %v4649_v61, %v2109_v27 }
 0x3fb   : > { %v2293_v31 = vadd.f32 %v2292_v23, %v2291_v16  ;;  %v2285_v15 = vrot.slane %v2284_v25, 2  ;;  %v2305_v32 = vadd.f32 %v2304_v3, %v2303_v20  ;;  %v2297_v34 = vrot.slane %v2296_v28, 4  ;;  %v3314_v35 = vpop.f32.mrf.mxu1 }
 0x3fc   : > { %v2317_v36 = vsel %vm1690_vm2, %v2269_v29, 0.0  ;;  %v2268_v37 = vmul.f32 %v2207_v59, %v2110_v26  ;;  %v2125_v39 = vadd.f32 %v3314_v35, %v4649_v61 }
 0x3fd   : > { %v2286_v13 = vadd.f32 %v2285_v15, %v2284_v25  ;;  %v2306_v40 = vrot.slane %v2305_v32, 2  ;;  %v2298_v41 = vadd.f32 %v2297_v34, %v2296_v28  ;;  %v2119_v42 = vpop.f32.mrf.mxu1  ;;  %v2318_v30 = vrot.slane %v2317_v36, 4 }
 0x3fe   : > { %v2310_v24 = vsel %vm1690_vm2, %v2268_v37, 0.0  ;;  %v2271_v44 = vmul.f32 %v2222_v38, %v2125_v39  ;;  %v2120_v33 = vadd.f32 %v4649_v61, %v2119_v42  ;;  %v2294_v46 = vrot.slane %v2293_v31, 1 }
 0x3ff   : > { %v2287_v47 = vrot.slane %v2286_v13, 1  ;;  %v2307_v48 = vadd.f32 %v2306_v40, %v2305_v32  ;;  %v2299_v43 = vrot.slane %v2298_v41, 2  ;;  %v2319_v51 = vadd.f32 %v2318_v30, %v2317_v36  ;;  %v3317_v55 = vpop.f32.mrf.mxu1 }
 0x400   : > { %v2311_v52 = vrot.slane %v2310_v24, 4  ;;  %v2331_v53 = vsel %vm1690_vm2, %v2271_v44, 0.0  ;;  %v2270_v54 = vmul.f32 %v2217_v17, %v2120_v33  ;;  %v2135_v1 = vadd.f32 %v3317_v55, %v4649_v61  ;;  %v2257_v44 = vpop.permute.xlu1 %2256 }
 0x401   : > { %v2288_v57 = vadd.f32 %v2287_v47, %v2286_v13  ;;  %v2300_v50 = vadd.f32 %v2299_v43, %v2298_v41  ;;  %v2332_v59 = vrot.slane %v2331_v53, 4  ;;  %v2320_v63 = vrot.slane %v2319_v51, 2  ;;  %v2129_v2 = vpop.f32.mrf.mxu1 }
 0x402   : > { %v2312_v45 = vadd.f32 %v2311_v52, %v2310_v24  ;;  %v2324_v0 = vsel %vm1690_vm2, %v2270_v54, 0.0  ;;  %v2295_v4 = vadd.f32 %v2294_v46, %v2293_v31  ;;  %v2308_v22 = vrot.slane %v2307_v48, 1 }
 0x403   : > { %v2301_v8 = vrot.slane %v2300_v50, 1  ;;  %v2333_v9 = vadd.f32 %v2332_v59, %v2331_v53  ;;  %v2321_v10 = vadd.f32 %v2320_v63, %v2319_v51  ;;  %v2325_v11 = vrot.slane %v2324_v0, 4  ;;  %v2280_v59 = vld [vmem:[#allocation2] sm:$0xff] }
 0x404   : > { %v2313_v60 = vrot.slane %v2312_v45, 2  ;;  %v2273_v12 = vmul.f32 %v4651_v62, %v2135_v1  ;;  %v3320_v56 = vpop.f32.mrf.mxu1  ;;  %v2130_v17 = vadd.f32 %v4649_v61, %v2129_v2  ;;  %v2411_v20 = vsel %vm2410_vm3, %v2295_v4, %v2288_v57 }
 0x405   : > { %v2302_v14 = vadd.f32 %v2301_v8, %v2300_v50  ;;  %v2334_v16 = vrot.slane %v2333_v9, 2  ;;  %v2145_v18 = vadd.f32 %v3320_v56, %v4649_v61  ;;  %v2326_v21 = vadd.f32 %v2325_v11, %v2324_v0 }
 0x406   : > { %v2314_v7 = vadd.f32 %v2313_v60, %v2312_v45  ;;  %v2345_v23 = vsel %vm1690_vm2, %v2273_v12, 0.0  ;;  %v2139_v25 = vpop.f32.mrf.mxu1  ;;  %v2309_v3 = vadd.f32 %v2308_v22, %v2307_v48  ;;  %v2272_v28 = vmul.f32 %v4644_v58, %v2130_v17  ;;  %v2262_v12 = vpop.permute.xlu1 %2261 }
 0x407   : > { %v2335_v27 = vadd.f32 %v2334_v16, %v2333_v9  ;;  %v2346_v62 = vrot.slane %v2345_v23, 4  ;;  %v2413_v29 = vsel %vm2412_vm4, %v2302_v14, %v2411_v20  ;;  %v2322_v26 = vrot.slane %v2321_v10, 1 }
 0x408   : > { %v2315_v31 = vrot.slane %v2314_v7, 1  ;;  %v2327_v15 = vrot.slane %v2326_v21, 2  ;;  %v3323_v32 = vpop.f32.mrf.mxu1  ;;  %v2338_v36 = vsel %vm1690_vm2, %v2272_v28, 0.0  ;;  %v2275_v37 = vmul.f32 %v4663_v5, %v2145_v18 }
 0x409   : > { %v2336_v34 = vrot.slane %v2335_v27, 1  ;;  %v2347_v35 = vadd.f32 %v2346_v62, %v2345_v23  ;;  %v2339_v40 = vrot.slane %v2338_v36, 4  ;;  %v2140_v38 = vadd.f32 %v4649_v61, %v2139_v25 }
 0x40a   : > { %v2316_v39 = vadd.f32 %v2315_v31, %v2314_v7  ;;  %v2328_v13 = vadd.f32 %v2327_v15, %v2326_v21  ;;  %v2149_v41 = vpop.f32.mrf.mxu1  ;;  %v2415_v58 = vsel %vm2414_vm5, %v2309_v3, %v2413_v29  ;;  %v2359_v30 = vsel %vm1690_vm2, %v2275_v37, 0.0 }
 0x40b   : > { %v2348_v42 = vrot.slane %v2347_v35, 2  ;;  %v2155_v24 = vadd.f32 %v3323_v32, %v4649_v61  ;;  %v2340_v47 = vadd.f32 %v2339_v40, %v2338_v36  ;;  %v2360_v48 = vrot.slane %v2359_v30, 4 }
 0x40c   : > { %v2417_v33 = vsel %vm2416_vm6, %v2316_v39, %v2415_v58  ;;  %v2329_v46 = vrot.slane %v2328_v13, 1  ;;  %v3326_v5 = vpop.f32.mrf.mxu1  ;;  %v2323_v43 = vadd.f32 %v2322_v26, %v2321_v10  ;;  %v2337_v51 = vadd.f32 %v2336_v34, %v2335_v27 }
 0x40d   : > { %v2274_v52 = vmul.f32 %v4655_v6, %v2140_v38  ;;  %v2277_v53 = vmul.f32 %v2252_v19, %v2155_v24  ;;  %v2341_v55 = vrot.slane %v2340_v47, 2  ;;  %v2361_v57 = vadd.f32 %v2360_v48, %v2359_v30 }
 0x40e   : > { %v2330_v54 = vadd.f32 %v2329_v46, %v2328_v13  ;;  %v2150_v50 = vadd.f32 %v4649_v61, %v2149_v41  ;;  %v2419_v63 = vsel %vm2418_vm7, %v2323_v43, %v2417_v33  ;;  %v2165_v1 = vadd.f32 %v3326_v5, %v4649_v61  ;;  %v2159_v8 = vpop.f32.mrf.mxu1 }
 0x40f   : > { %v2352_v45 = vsel %vm1690_vm2, %v2274_v52, 0.0  ;;  %v2373_v0 = vsel %vm1690_vm2, %v2277_v53, 0.0  ;;  %v2349_v4 = vadd.f32 %v2348_v42, %v2347_v35  ;;  %v2342_v22 = vadd.f32 %v2341_v55, %v2340_v47  ;;  %v2281_v55 = vld [vmem:[#allocation2 + $0x8] sm:$0xff] }
 0x410   : > { %v2421_v2 = vsel %vm2420_vm8, %v2330_v54, %v2419_v63  ;;  %v2353_v6 = vrot.slane %v2352_v45, 4  ;;  %v2362_v10 = vrot.slane %v2361_v57, 2  ;;  %v2374_v60 = vrot.slane %v2373_v0, 4 }
 0x411   : > { %v2423_v9 = vsel %vm2422_vm9, %v2337_v51, %v2421_v2  ;;  %v2276_v11 = vmul.f32 %v4671_v49, %v2150_v50  ;;  %v2343_v14 = vrot.slane %v2342_v22, 1  ;;  %v2279_v19 = vmul.f32 %v2262_v12, %v2165_v1 }
 0x412   : > { %v2433_v56 = vadd.f32 %v2423_v9, %v2280_v59  ;;  %v2354_v16 = vadd.f32 %v2353_v6, %v2352_v45  ;;  %v2375_v17 = vadd.f32 %v2374_v60, %v2373_v0  ;;  %v2160_v20 = vadd.f32 %v4649_v61, %v2159_v8 }
 0x413   : > { %v2366_v18 = vsel %vm1690_vm2, %v2276_v11, 0.0  ;;  %v2350_v7 = vrot.slane %v2349_v4, 1  ;;  %v2363_v25 = vadd.f32 %v2362_v10, %v2361_v57  ;;  %v2387_v27 = vsel %vm1690_vm2, %v2279_v19, 0.0 }
 0x414   : > { %2435 = vst.msk [vmem:[#allocation2] sm:$0xff] %vm1690_vm2, %v2433_v56  ;;  %v2355_v21 = vrot.slane %v2354_v16, 2  ;;  %v2367_v23 = vrot.slane %v2366_v18, 4  ;;  %v2376_v3 = vrot.slane %v2375_v17, 2  ;;  %v2278_v49 = vmul.f32 %v2257_v44, %v2160_v20 }
 0x415   : > { %v2344_v29 = vadd.f32 %v2343_v14, %v2342_v22  ;;  %v2388_v26 = vrot.slane %v2387_v27, 4  ;;  %v2351_v61 = vadd.f32 %v2350_v7, %v2349_v4  ;;  %v2364_v35 = vrot.slane %v2363_v25, 1 }
 0x416   : > { %v2356_v62 = vadd.f32 %v2355_v21, %v2354_v16  ;;  %v2368_v28 = vadd.f32 %v2367_v23, %v2366_v18  ;;  %v2380_v31 = vsel %vm1690_vm2, %v2278_v49, 0.0  ;;  %v2377_v36 = vadd.f32 %v2376_v3, %v2375_v17 }
 0x417   : > { %v2381_v34 = vrot.slane %v2380_v31, 4  ;;  %v2389_v37 = vadd.f32 %v2388_v26, %v2387_v27  ;;  %v2424_v38 = vsel %vm2410_vm3, %v2351_v61, %v2344_v29  ;;  %v2365_v24 = vadd.f32 %v2364_v35, %v2363_v25 }
 0x418   : > { %v2357_v15 = vrot.slane %v2356_v62, 1  ;;  %v2369_v32 = vrot.slane %v2368_v28, 2  ;;  %v2378_v44 = vrot.slane %v2377_v36, 1 }
 0x419   : > { %v2382_v40 = vadd.f32 %v2381_v34, %v2380_v31  ;;  %v2390_v41 = vrot.slane %v2389_v37, 2 }
 0x41a   : > { %v2358_v39 = vadd.f32 %v2357_v15, %v2356_v62  ;;  %v2370_v13 = vadd.f32 %v2369_v32, %v2368_v28  ;;  %v2379_v52 = vadd.f32 %v2378_v44, %v2377_v36 }
 0x41b   : > { %v2383_v30 = vrot.slane %v2382_v40, 2  ;;  %v2391_v33 = vadd.f32 %v2390_v41, %v2389_v37 }
 0x41c   : > { %v2425_v58 = vsel %vm2412_vm4, %v2358_v39, %v2424_v38  ;;  %v2371_v42 = vrot.slane %v2370_v13, 1 }
 0x41d   : > { %v2384_v47 = vadd.f32 %v2383_v30, %v2382_v40  ;;  %v2426_v48 = vsel %vm2414_vm5, %v2365_v24, %v2425_v58  ;;  %v2392_v5 = vrot.slane %v2391_v33, 1 }
 0x41e   : > { %v2372_v46 = vadd.f32 %v2371_v42, %v2370_v13 }
 0x41f   : > { %v2385_v51 = vrot.slane %v2384_v47, 1  ;;  %v2393_v54 = vadd.f32 %v2392_v5, %v2391_v33 }
 0x420   : > { %v2427_v43 = vsel %vm2416_vm6, %v2372_v46, %v2426_v48 }
 0x421   : > { %v2386_v53 = vadd.f32 %v2385_v51, %v2384_v47  ;;  %v2428_v57 = vsel %vm2418_vm7, %v2379_v52, %v2427_v43 }
 0x423   : > { %v2429_v50 = vsel %vm2420_vm8, %v2386_v53, %v2428_v57  ;;  %2440 = sbr.rel (%p3093_p3) target bundleno = 2109 (0x83d), region = 208 }
 0x424   : > { %v2430_v59 = vsel %vm2422_vm9, %v2393_v54, %v2429_v50 }
 0x425   : > { %v2434_v63 = vadd.f32 %v2430_v59, %v2281_v55 }
 0x427   : > { %2436 = vst.msk [vmem:[#allocation2 + $0x8] sm:$0xff] %vm1690_vm2, %v2434_v63 }
 0x428   : > { %v2441_v45 = vld [vmem:[%s4361_s14] sm:$0xff]  ;;  %v2442_v1 = vld [vmem:[%s4361_s14 + $0x8] sm:$0xff]  ;;  %v2495_v19 = vld [vmem:[%s4959_s15 + $0x18] sm:$0xff] }
 0x429   : > { %v2443_v0 = vld [vmem:[#allocation2] sm:$0xff]  ;;  %v2494_v20 = vld [vmem:[%s4959_s15 + $0x10] sm:$0xff]  ;;  %3327 = vmatprep.subr.mxu0 %v2495_v19  ;;  %v2493_v7 = vld [vmem:[%s4959_s15 + $0x8] sm:$0xff] }
 0x42a   : > { %v2445_v2 = vadd.f32 %v2443_v0, %v2441_v45  ;;  %3328 = vmatpush3.msra.mxu0 %v2495_v19  ;;  %v2492_v21 = vld [vmem:[%s4959_s15] sm:$0xff]  ;;  %v2609_v23 = vld [vmem:[%s4960_s17 + $0x78] sm:$0xff]  ;;  %v2608_v25 = vld [vmem:[%s4960_s17 + $0x70] sm:$0xff] }
 0x42b   : > { %3329 = vmatprep.subr.mxu0 %v2494_v20  ;;  %3338 = vmatprep.subr.mxu1 %v2609_v23  ;;  %v2607_v3 = vld [vmem:[%s4960_s17 + $0x68] sm:$0xff]  ;;  %v3094_v15 = vld [vmem:[%s4961_s13] ss:$0 sm:$0xff]  ;;  %v2605_v38 = vld [vmem:[%s4960_s17 + $0x58] sm:$0xff] }
 0x42c   : > { %v2449_v6 = vsel %vm1690_vm2, %v2445_v2, 0.0  ;;  %3330 = vmatpush3.msra.mxu0 %v2494_v20  ;;  %3339 = vmatpush3.msra.mxu1 %v2609_v23  ;;  %v3095_v34 = vld [vmem:[%s4962_s19] ss:$0 sm:$0xff]  ;;  %v2604_v41 = vld [vmem:[%s4960_s17 + $0x50] sm:$0xff]  ;;  %v2603_v58 = vld [vmem:[%s4960_s17 + $0x48] sm:$0xff] }
 0x42d   : > { %2450 = vadd.xlane.f32.xlu0 %v2449_v6  ;;  %3331 = vmatprep.subr.mxu0 %v2493_v7  ;;  %v2606_v40 = vld [vmem:[%s4960_s17 + $0x60] sm:$0xff]  ;;  %v2601_v30 = vld [vmem:[%s4960_s17 + $0x38] sm:$0xff]  ;;  %v2600_v24 = vld [vmem:[%s4960_s17 + $0x30] sm:$0xff] }
 0x42e   : > { %v2444_v4 = vld [vmem:[#allocation2 + $0x8] sm:$0xff]  ;;  %3332 = vmatpush3.msra.mxu0 %v2493_v7  ;;  %3340 = vmatprep.subr.mxu1 %v2608_v25  ;;  %v2602_v42 = vld [vmem:[%s4960_s17 + $0x40] sm:$0xff]  ;;  %v2597_v46 = vld [vmem:[%s4960_s17 + $0x18] sm:$0xff] }
 0x42f   : > { %v2446_v22 = vadd.f32 %v2444_v4, %v2442_v1  ;;  %3333 = vmatprep.subr.mxu0 %v2492_v21  ;;  %3341 = vmatpush3.msra.mxu1 %v2608_v25  ;;  %v2599_v44 = vld [vmem:[%s4960_s17 + $0x28] sm:$0xff]  ;;  %v2598_v33 = vld [vmem:[%s4960_s17 + $0x20] sm:$0xff]  ;;  %v2596_v47 = vld [vmem:[%s4960_s17 + $0x10] sm:$0xff] }
 0x430   : > { %3334 = vmatpush3.msra.mxu0 %v2492_v21  ;;  %3342 = vmatprep.subr.mxu1 %v2607_v3  ;;  %v2595_v48 = vld [vmem:[%s4960_s17 + $0x8] sm:$0xff]  ;;  %v2594_v5 = vld [vmem:[%s4960_s17] sm:$0xff] }
 0x431   : > { %v2452_v8 = vsel %vm1690_vm2, %v2446_v22, 0.0  ;;  %3343 = vmatpush3.msra.mxu1 %v2607_v3  ;;  %v3096_v43 = vld [vmem:[%s4963_s22] ss:$0 sm:$0xff] }
 0x432   : > { %2453 = vadd.xlane.f32.xlu0 %v2452_v8  ;;  %3344 = vmatprep.subr.mxu1 %v2606_v40 }
 0x433   : > { %3345 = vmatpush3.msra.mxu1 %v2606_v40 }
 0x434   : > { %3346 = vmatprep.subr.mxu1 %v2605_v38 }
 0x435   : > { %3347 = vmatpush3.msra.mxu1 %v2605_v38 }
 0x436   : > { %3348 = vmatprep.subr.mxu1 %v2604_v41 }
 0x437   : > { %3349 = vmatpush3.msra.mxu1 %v2604_v41 }
 0x438   : > { %3350 = vmatprep.subr.mxu1 %v2603_v58 }
 0x439   : > { %3351 = vmatpush3.msra.mxu1 %v2603_v58 }
 0x43a   : > { %3352 = vmatprep.subr.mxu1 %v2602_v42 }
 0x43b   : > { %3353 = vmatpush3.msra.mxu1 %v2602_v42 }
 0x43c   : > { %3354 = vmatprep.subr.mxu1 %v2601_v30 }
 0x43d   : > { %3355 = vmatpush3.msra.mxu1 %v2601_v30 }
 0x43e   : > { %3356 = vmatprep.subr.mxu1 %v2600_v24 }
 0x43f   : > { %3357 = vmatpush3.msra.mxu1 %v2600_v24 }
 0x440   : > { %3358 = vmatprep.subr.mxu1 %v2599_v44 }
 0x441   : > { %3359 = vmatpush3.msra.mxu1 %v2599_v44 }
 0x442   : > { %3360 = vmatprep.subr.mxu1 %v2598_v33 }
 0x443   : > { %3361 = vmatpush3.msra.mxu1 %v2598_v33 }
 0x444   : > { %3362 = vmatprep.subr.mxu1 %v2597_v46 }
 0x445   : > { %3363 = vmatpush3.msra.mxu1 %v2597_v46 }
 0x446   : > { %3364 = vmatprep.subr.mxu1 %v2596_v47 }
 0x447   : > { %3365 = vmatpush3.msra.mxu1 %v2596_v47 }
 0x448   : > { %3366 = vmatprep.subr.mxu1 %v2595_v48 }
 0x449   : > { %3367 = vmatpush3.msra.mxu1 %v2595_v48 }
 0x44a   : > { %3368 = vmatprep.subr.mxu1 %v2594_v5 }
 0x44b   : > { %3369 = vmatpush3.msra.mxu1 %v2594_v5 }
 0x4b6   : > { %v2451_v9 = vpop.xlane.xlu0 %2450 }
 0x4b7   : > { %v2456_v10 = vmul.f32 0.03125, %v2451_v9 }
 0x4b9   : > { %v2458_v60 = vsub.f32 %v2445_v2, %v2456_v10 }
 0x4bb   : > { %v2454_v11 = vpop.xlane.xlu0 %2453  ;;  %v2460_v56 = vmul.f32 %v2458_v60, %v2458_v60 }
 0x4bc   : > { %v2457_v12 = vmul.f32 0.03125, %v2454_v11 }
 0x4bd   : > { %v2462_v16 = vsel %vm1690_vm2, %v2460_v56, 0.0 }
 0x4be   : > { %v2459_v14 = vsub.f32 %v2446_v22, %v2457_v12  ;;  %2463 = vadd.xlane.f32.xlu1 %v2462_v16  ;;  %v3099_v22 = vld [vmem:[%s4964_s18] ss:$0 sm:$0xff] }
 0x4c0   : > { %v2461_v17 = vmul.f32 %v2459_v14, %v2459_v14 }
 0x4c2   : > { %v2465_v18 = vsel %vm1690_vm2, %v2461_v17, 0.0 }
 0x4c3   : > { %2466 = vadd.xlane.f32.xlu1 %v2465_v18 }
 0x547   : > { %v2464_v27 = vpop.xlane.xlu1 %2463 }
 0x548   : > { %v2468_v49 = vmul.f32 0.03125, %v2464_v27  ;;  %v2739_v27 = vld [vmem:[%s4366_s11 + $0x8] sm:$0xff] }
 0x54a   : > { %v2470_v62 = vadd.f32 1e-05, %v2468_v49  ;;  %v2738_v49 = vld [vmem:[%s4366_s11] sm:$0xff] }
 0x54c   : > { %v2467_v28 = vpop.xlane.xlu1 %2466  ;;  %3671 = vrsqrt.f32 %v2470_v62 }
 0x54d   : > { %v2469_v29 = vmul.f32 0.03125, %v2467_v28 }
 0x54f   : > { %v2471_v26 = vadd.f32 1e-05, %v2469_v29 }
 0x551   : > { %3673 = vrsqrt.f32 %v2471_v26 }
 0x559   : > { %v3672_v31 = vpop.eup %3671 }
 0x55a   : > { %v2474_v32 = vmul.f32 %v3672_v31, %v2458_v60 }
 0x55c   : > { %v2482_v61 = vmul.f32 %v3094_v15, %v2474_v32 }
 0x55e   : > { %v3674_v35 = vpop.eup %3673  ;;  %v4746_v37 = vadd.f32 %v3095_v34, %v2482_v61 }
 0x55f   : > { %v2475_v36 = vmul.f32 %v3674_v35, %v2459_v14  ;;  %v3924_v14 = vmov 0  }
 0x560   : > { %3335 = vmatprep.mubr.msk.f32.mxu0 %vm1690_vm2, %v4746_v37  ;;  %3670 = vset.pattern.permute.xlu1 %v3924_v14 }
 0x561   : > { %v2483_v39 = vmul.f32 %v3094_v15, %v2475_v36  ;;  %3669 = vset.pattern.permute.xlu0 %v3924_v14  ;;  %v3101_v36 = vld [vmem:[%s4966_s29] ss:$0 sm:$0xff] }
 0x563   : > { %v4750_v13 = vadd.f32 %v3095_v34, %v2483_v39  ;;  %v3100_v34 = vld [vmem:[%s4965_s20] ss:$0 sm:$0xff] }
 0x565   : > { %3336 = vmatmul.mubr.msk.f32.vlgmr.msra.gmra.mxu0 %vm1690_vm2, %v4750_v13 }
 0x625   : > { %v3337_v51 = vpop.f32.mrf.mxu0 }
 0x626   : > { %v2581_v52 = vadd.f32 %v3337_v51, %v3096_v43 }
 0x627   : > { %v2575_v53 = vpop.f32.mrf.mxu0 }
 0x628   : > { %v2587_v54 = vmul.f32 0.70710677, %v2581_v52  ;;  %v2576_v55 = vadd.f32 %v3096_v43, %v2575_v53  ;;  %v2585_v1 = vmul.f32 0.5, %v2581_v52 }
 0x62a   : > { %3675 = verf.f32 %v2587_v54  ;;  %v2586_v57 = vmul.f32 0.70710677, %v2576_v55  ;;  %v2584_v45 = vmul.f32 0.5, %v2576_v55 }
 0x62c   : > { %3677 = verf.f32 %v2586_v57 }
 0x637   : > { %v3676_v50 = vpop.eup %3675 }
 0x638   : > { %v2591_v63 = vadd.f32 1.0, %v3676_v50 }
 0x639   : > { %v3678_v59 = vpop.eup %3677 }
 0x63a   : > { %v2590_v0 = vadd.f32 1.0, %v3678_v59  ;;  %v2593_v4 = vmul.f32 %v2591_v63, %v2585_v1 }
 0x63c   : > { %v2592_v2 = vmul.f32 %v2590_v0, %v2584_v45 }
 0x63e   : > { %3370 = vmatprep.mubr.f32.mxu1 %v2592_v2 }
 0x63f   : > { %3371 = vmatmul.mubr.f32.vlgmr.msra.gmra.mxu1 %v2593_v4 }
 0x6ff   : > { %v3372_v6 = vpop.f32.mrf.mxu1 }
 0x700   : > { %v2689_v8 = vadd.f32 %v3372_v6, %v3099_v22 }
 0x701   : > { %v2683_v9 = vpop.f32.mrf.mxu1 }
 0x702   : > { %v2684_v10 = vadd.f32 %v3099_v22, %v2683_v9  ;;  %v2693_v60 = vadd.f32 %v2689_v8, %v4750_v13 }
 0x704   : > { %v2699_v11 = vsel %vm1690_vm2, %v2693_v60, 0.0  ;;  %v2692_v12 = vadd.f32 %v2684_v10, %v4746_v37 }
 0x705   : > { %2700 = vadd.xlane.f32.xlu1 %v2699_v11 }
 0x706   : > { %v2696_v56 = vsel %vm1690_vm2, %v2692_v12, 0.0 }
 0x707   : > { %2697 = vadd.xlane.f32.xlu0 %v2696_v56 }
 0x78e   : > { %v2701_v16 = vpop.xlane.xlu1 %2700 }
 0x78f   : > { %v2703_v17 = vmul.f32 0.03125, %v2701_v16 }
 0x790   : > { %v2698_v18 = vpop.xlane.xlu0 %2697 }
 0x791   : > { %v2705_v19 = vsub.f32 %v2693_v60, %v2703_v17  ;;  %v2702_v20 = vmul.f32 0.03125, %v2698_v18 }
 0x793   : > { %v2704_v7 = vsub.f32 %v2692_v12, %v2702_v20  ;;  %v2707_v21 = vmul.f32 %v2705_v19, %v2705_v19 }
 0x795   : > { %v2711_v23 = vsel %vm1690_vm2, %v2707_v21, 0.0  ;;  %v2706_v25 = vmul.f32 %v2704_v7, %v2704_v7 }
 0x796   : > { %2712 = vadd.xlane.f32.xlu1 %v2711_v23 }
 0x797   : > { %v2708_v3 = vsel %vm1690_vm2, %v2706_v25, 0.0 }
 0x798   : > { %2709 = vadd.xlane.f32.xlu0 %v2708_v3 }
 0x7a7   : > { %2747 = vperm.xlu1 %3670, %v2739_v27  }
 0x7ae   : > { %2742 = vperm.xlu0 %3669, %v2738_v49  }
 0x81f   : > { %v2713_v62 = vpop.xlane.xlu1 %2712 }
 0x820   : > { %v2715_v28 = vmul.f32 0.03125, %v2713_v62 }
 0x821   : > { %v2710_v29 = vpop.xlane.xlu0 %2709 }
 0x822   : > { %v2717_v26 = vadd.f32 1e-05, %v2715_v28  ;;  %v2714_v31 = vmul.f32 0.03125, %v2710_v29 }
 0x823   : > { %v2748_v13 = vpop.permute.xlu1 %2747 }
 0x824   : > { %3679 = vrsqrt.f32 %v2717_v26  ;;  %v2716_v15 = vadd.f32 1e-05, %v2714_v31 }
 0x826   : > { %3681 = vrsqrt.f32 %v2716_v15 }
 0x829   : > { %v2743_v41 = vpop.permute.xlu0 %2742 }
 0x831   : > { %v3680_v32 = vpop.eup %3679 }
 0x832   : > { %v2721_v61 = vmul.f32 %v3680_v32, %v2705_v19 }
 0x833   : > { %v3682_v35 = vpop.eup %3681 }
 0x834   : > { %v2729_v37 = vmul.f32 %v3100_v34, %v2721_v61  ;;  %v2720_v39 = vmul.f32 %v3682_v35, %v2704_v7 }
 0x836   : > { %v2737_v40 = vadd.f32 %v3101_v36, %v2729_v37  ;;  %v2728_v38 = vmul.f32 %v3100_v34, %v2720_v39 }
 0x838   : > { %v2751_v58 = vmul.f32 %v2748_v13, %v2737_v40  ;;  %v2736_v42 = vadd.f32 %v3101_v36, %v2728_v38 }
 0x83a   : > { %2753 = vst.msk [vmem:[%s4370_s0 + $0x8] sm:$0xff] %vm1690_vm2, %v2751_v58  ;;  %v2750_v30 = vmul.f32 %v2743_v41, %v2736_v42 }
 0x83c   : > { %2752 = vst.msk [vmem:[%s4370_s0] sm:$0xff] %vm1690_vm2, %v2750_v30 }
 0x83d PF: > { %s4819_s16 = scalar_lea.sflag [#allocation7], %s1034_s27  ;;  %2761 = sbr.rel (!%p4100_p7) target bundleno = 2142 (0x85e), region = 212 }
 0x83e   : > { %s2763_s21 = ssub.s32 (%p4100_p7), 3, %s4324_s26 }
 0x83f   : > { %p2764_p11 = scmp.lt.s32.totalorder (%p4100_p7), %s2763_s21, 2 }
 0x842   : > { %s5003_s21 = smov (!%p2764_p11, %s2763_s21), 2 }
 0x843   : > { %s4824_s22 = sshll.u32 %s5003_s21, 7 }
 0x844   : > { %s2768_s14 = ssub.s32 256, %s4824_s22 }
 0x845   : > { %2769 = vsyncadd %s4819_s16, %s2768_s14  ;;  %p3105_p13 = scmp.ne.s32.totalorder %s4824_s22, 0  ;;  %s3117_s27 = sshll.u32 %s3843_s2, 8 }
 0x846   : > { %s4968_s13 = sld [smem:[#allocation29_spill]]  ;;  %s2774_s26 = sshll.u32 %s4370_s0, 4  ;;  %s4836_s26 = int_to_ptr.vmem [resolvable:$true] %s2774_s26 }
 0x847   : > { %s3683_s20 = scalar_lea.vmem %s4836_s26, %s4824_s22  ;;  %s3925_s19 = smov [#allocation6]  }
 0x848   : > { %p3684_p7 = scmp.ne.s32.totalorder %s4836_s26, %s3683_s20  ;;  %s3687_s11 = sshll.u32 %s3925_s19, 4  ;;  %s3688_s11 = int_to_ptr.vmem [resolvable:$false] %s3687_s11 }
 0x849   : > { %s3689_s2 = scalar_lea.vmem %s3688_s11, 512  ;;  %p3690_p2 = scmp.lt.s32.totalorder %s4836_s26, %s3688_s11 }
 0x84a   : > { %p3685_p0 = pnand %p3684_p7, %p3105_p13  ;;  %p3691_p4 = scmp.lt.s32.totalorder %s3689_s2, %s3683_s20 }
 0x84c   : > { %s4833_s3 = scalar_lea.hbm %s4968_s13, %s3117_s27  ;;  %p3686_p1 = pneg %p3685_p0 }
 0x84d   : > { %p3692_p5 = por %p3691_p4, %p3690_p2 }
 0x84f   : > { %p3693_p6 = pnand %p3692_p5, %p3686_p1 }
 0x851   : > { %3696 = shalt.err (!%p3693_p6)
}
 0x852   : > { %s3697_s0 = scalar_lea.hbm %s4833_s3, %s4824_s22  ;;  %s3701_s21 = scalar_lea.hbm %s4968_s13, 384 }
 0x853   : > { %p3698_p8 = scmp.ne.s32.totalorder %s4833_s3, %s3697_s0  ;;  %p3702_p3 = scmp.lt.s32.totalorder %s4833_s3, %s4968_s13 }
 0x854   : > { %p3703_p11 = scmp.lt.s32.totalorder %s3701_s21, %s3697_s0 }
 0x855   : > { %p3699_p9 = pnand %p3698_p8, %p3105_p13 }
 0x856   : > { %p3704_p7 = por %p3703_p11, %p3702_p3 }
 0x857   : > { %p3700_p10 = pneg %p3699_p9 }
 0x859   : > { %p3705_p0 = pnand %p3704_p7, %p3700_p10 }
 0x85b   : > { %3708 = shalt.err (!%p3705_p0)
}
 0x85c   : > { %s3926_s12 = smov 128   ;;  %s3927_s18 = smov 8  }
 0x85d   : > { %2780 = dma.vmem_to_hbm [thread:$0]  (%p3105_p13), %s4836_s26, %s4824_s22, %s4833_s3, %s4819_s16, %s3926_s12, %s3926_s12, %s3927_s18  }
 0x85e PF: > { %s4969_s20 = sld [smem:[#allocation9_spill]]  ;;  %p3386_p1 = scmp.ge.s32.totalorder %s3855_s25, 2 }
 0x860   : > { %p3383_p2 = pnand %p3386_p1, %p4108_p12 }
 0x862   : > { %p3384_p4 = pneg %p3383_p2 }
 0x864   : > { %s2789_s11 = sand.u32 1, %s4969_s20  }
 0x865   : > { %s2790_s2 = scalar_lea.sflag [#allocation7], %s2789_s11 }
 0x866   : > { %3814 = dma.done.wait (%p3384_p4), %s2790_s2, 256  }
 0x867   : > { %3816 = vsyncadd (%p3384_p4), %s2790_s2, 4294967040  ;;  %s32_s25 = sadd.s32 1, %s3855_s25   ;;  %s4971_s29 = sld [smem:[#allocation10_spill]] }
 0x868   : > { %p29_p5 = scmp.ge.s32.totalorder %s32_s25, 6   ;;  %s4972_s20 = sld [smem:[#allocation15_spill]] }
 0x869   : > { %s4973_s16 = sld [smem:[#allocation16_spill]]  ;;  %s4976_s0 = smov %s3823_s30 }
 0x86a   : > { %s4974_s3 = sld [smem:[#allocation11_spill]]  ;;  %s4978_s21 = smov %s3835_s1 }
 0x86b   : > { %s4975_s26 = sld [smem:[#allocation12_spill]]  ;;  %s4980_s22 = smov %s3847_s23 }
 0x86c   : > { %s4981_s2 = smov %s3851_s24 }
 0x86d   : > { %s4977_s30 = smov %s4971_s29  ;;  %31 = sbr.rel (!%p29_p5) target bundleno = 20 (0x14), region = 322 }
 0x86f   : > { %s4979_s1 = smov %s4973_s16 }
 0x870   : > { %s4982_s23 = smov %s4974_s3 }
 0x871   : > { %s4983_s24 = smov %s4975_s26 }
 0x872   :  { %2795 = vsyncpa [#allocation7], 1 }
 0x873   :  { %2797 = vsyncpa [#allocation7 + $0x1], 1 }

</bundles_post_ra>
